<compile_context>
chip_gen: v7x
topology: tpu7x:2x2x1
jax: 0.10.0
libtpu: 0.0.40
codegen_flags: <defaults>
</compile_context>

<pallas_src>
import jax
import jax.numpy as jnp
from jax import lax
from jax.experimental import pallas as pl
from jax.experimental.pallas import tpu as pltpu

# ---------------- config (mirrors cfg_model fields used by forward) -------------
NUM_CLASSES     = 100            # self.num_classes
NUM_CLASSES_PAD = 128            # lane-dense one-hot width
TIME_DIM        = 32             # cfg.time_embedding.dim
HIDDEN          = 128            # decoder hidden dim
HEADS_PAD       = 128            # fused head width: [pred_t(100) | pred_f(3) | lattice(9) | pad]
D_DENSE         = 3 + TIME_DIM + 9     # frac_coords | time_emb | lattice (flattened) = 44
D_IN            = 48             # packed per-atom slab: dense(44) | atom_type | batch_idx | pad(2)
K_IN            = NUM_CLASSES_PAD + D_IN   # 176: fused layer-1 K
TIMESTEPS       = 10             # cfg.timesteps
COST_LATTICE    = 1.0            # loss_func weights
COST_COORD      = 1.0

# fused head column layout (lane-dense 128-wide)
PRED_T_OFF = 0        # cols   0:100 -> pred_t  (computed, unused: loss_type == 0.0)
PRED_F_OFF = 100      # cols 100:103 -> pred_f  (coord loss)
LAT_OFF    = 103      # cols 103:112 -> per-atom lattice-head contribution (wl folded in)


# ========================= fused decoder + loss Pallas kernel ====================

def run_decoder_loss(xin, tarf, params, *, n_graphs, tile_n):
    """Tiled per-node MLP decoder with fused heads + per-graph pooled lattice partials
    + coord-loss partial sums.  Grid = (2 core-split, atom tiles).

    xin:  (N_pad, 48) bf16  [frac|time_emb|lattice | atom_type | batch_idx(-1 on pad) | 0,0]
    tarf: (N_pad, 3)  f32   coord-noise target
    returns: lat_partials (2, B, 9) f32  (per-core segment sums of the lattice columns)
             sq_partials  (2, 1, 1) f32  (per-core coord squared-error sums)
    """
    N_pad, d_in = xin.shape
    assert d_in == D_IN
    assert tile_n % 8 == 0
    assert N_pad % (2 * tile_n) == 0, "pad atoms to a multiple of 2*tile_n (2-way core split)"
    n_tiles = N_pad // tile_n
    n_half = n_tiles // 2
    B = n_graphs

    def kernel(xin_ref, tarf_ref, w1_ref, b1_ref, w2_ref, b2_ref, wh_ref, bh_ref,
               lat_ref, sq_ref):
        i = pl.program_id(1)

        @pl.when(i == 0)
        def _init():
            lat_ref[...] = jnp.zeros_like(lat_ref)
            sq_ref[...] = jnp.zeros_like(sq_ref)

        xin_t = xin_ref[...]                                          # (T, 48) bf16
        xf = xin_t.astype(jnp.float32)
        at = xf[:, D_DENSE:D_DENSE + 1].astype(jnp.int32)             # (T, 1) exact ints 0..99
        bidx = xf[:, D_DENSE + 1:D_DENSE + 2]                         # (T, 1) f32, -1 on pad rows

        # ---- layer 1: single K=176 matmul over [one-hot(128) | packed features(48)] ----
        oh = (lax.broadcasted_iota(jnp.int32, (tile_n, NUM_CLASSES_PAD), 1) == at
              ).astype(jnp.bfloat16)                                   # (T, 128)
        lhs = jnp.concatenate([oh, xin_t], axis=-1)                    # (T, 176) bf16, aligned @128
        h = (jnp.dot(lhs, w1_ref[...], preferred_element_type=jnp.float32)
             + b1_ref[...])
        h = jnp.maximum(h, 0.0).astype(jnp.bfloat16)                   # ReLU in f32, cast for MXU

        # ---- layer 2 ----
        h2 = (jnp.dot(h, w2_ref[...], preferred_element_type=jnp.float32)
              + b2_ref[...])
        h2 = jnp.maximum(h2, 0.0).astype(jnp.bfloat16)

        # ---- fused lane-dense heads: [pred_t | pred_f | lattice-contrib | pad] ----
        heads = (jnp.dot(h2, wh_ref[...], preferred_element_type=jnp.float32)
                 + bh_ref[...])                                        # (T, 128) f32

        # ---- coord-loss partial sum (pad rows excluded via batch-idx sentinel) ----
        valid = (bidx >= 0.0).astype(jnp.float32)                      # (T, 1)
        df = (heads[:, PRED_F_OFF:PRED_F_OFF + 3] - tarf_ref[...]) * valid
        sq_ref[...] += jnp.sum(df * df, keepdims=True)[None]           # (1, 1, 1)

        # ---- per-graph segment sum of the folded lattice-head columns (no MXU) ----
        lat_cols = heads[:, LAT_OFF:LAT_OFF + 9]                       # (T, 9)
        contrib = jnp.zeros((B, 9), jnp.float32)
        for g in range(B):                                             # B is small (2-8)
            m = (bidx == float(g)).astype(jnp.float32)                 # (T, 1); pad rows never match
            row = jnp.sum(lat_cols * m, axis=0, keepdims=True)         # (1, 9) sublane reduce
            sel = (lax.broadcasted_iota(jnp.int32, (B, 1), 0) == g).astype(jnp.float32)
            contrib = contrib + sel * row                              # place at graph row g
        lat_ref[...] += contrib[None]                                  # (1, B, 9)

    w1, b1 = params["w1"], params["b1"]
    w2, b2 = params["w2"], params["b2"]
    wh, bh = params["wh"], params["bh"]

    def const_spec(a):
        # Pallas skips re-DMA for unchanging block indices, so these stay resident.
        return pl.BlockSpec(a.shape, lambda c, i: (0,) * a.ndim)

    grid_spec = pltpu.PrefetchScalarGridSpec(
        num_scalar_prefetch=0,
        grid=(2, n_half),                                  # (core split, atom tiles) — reduction last
        in_specs=[
            pl.BlockSpec((tile_n, D_IN), lambda c, i: (c * n_half + i, 0)),   # packed features
            pl.BlockSpec((tile_n, 3),    lambda c, i: (c * n_half + i, 0)),   # tar_f (f32)
            const_spec(w1), const_spec(b1), const_spec(w2), const_spec(b2),
            const_spec(wh), const_spec(bh),
        ],
        out_specs=(
            pl.BlockSpec((1, B, 9), lambda c, i: (c, 0, 0)),   # per-core lattice partial sums
            pl.BlockSpec((1, 1, 1), lambda c, i: (c, 0, 0)),   # per-core coord sq-sum partials
        ),
    )

    out_shape = (
        jax.ShapeDtypeStruct((2, B, 9), jnp.float32),
        jax.ShapeDtypeStruct((2, 1, 1), jnp.float32),
    )

    flops = 2 * N_pad * HIDDEN * (K_IN + HIDDEN + HEADS_PAD)
    bytes_accessed = (
        int(xin.size) * 2 + int(tarf.size) * 4
        + sum(int(v.size) * v.dtype.itemsize for v in (w1, b1, w2, b2, wh, bh))
        + 2 * B * 9 * 4 + 2 * 4)

    return pl.pallas_call(
        kernel,
        out_shape=out_shape,
        grid_spec=grid_spec,
        compiler_params=pltpu.CompilerParams(
            dimension_semantics=("parallel", "arbitrary"),
            vmem_limit_bytes=48 * 1024 * 1024),
        cost_estimate=pl.CostEstimate(flops=flops, transcendentals=0,
                                      bytes_accessed=bytes_accessed),
    )(xin, tarf, w1, b1, w2, b2, wh, bh)


# ================================ plain-JAX glue ================================

def sinusoidal_time_embedding(times, dim):
    half = dim // 2
    freqs = jnp.exp(-jnp.log(10000.0) * jnp.arange(half, dtype=jnp.float32) / half)
    args = times.astype(jnp.float32)[:, None] * freqs[None, :]
    return jnp.concatenate([jnp.sin(args), jnp.cos(args)], axis=-1)


def lattice_params_to_matrix(lengths, angles_deg):
    """Equivalent of lattice_params_to_matrix_torch (CDVAE convention)."""
    ang = jnp.deg2rad(angles_deg)
    coses, sins = jnp.cos(ang), jnp.sin(ang)
    val = (coses[:, 0] * coses[:, 1] - coses[:, 2]) / (sins[:, 0] * sins[:, 1])
    gamma_star = jnp.arccos(jnp.clip(val, -1.0, 1.0))
    zeros = jnp.zeros_like(lengths[:, 0])
    vec_a = jnp.stack([lengths[:, 0] * sins[:, 1], zeros, lengths[:, 0] * coses[:, 1]], axis=1)
    vec_b = jnp.stack([-lengths[:, 1] * sins[:, 0] * jnp.cos(gamma_star),
                       lengths[:, 1] * sins[:, 0] * jnp.sin(gamma_star),
                       lengths[:, 1] * coses[:, 0]], axis=1)
    vec_c = jnp.stack([zeros, zeros, lengths[:, 2]], axis=1)
    return jnp.stack([vec_a, vec_b, vec_c], axis=1)          # (B, 3, 3)


def make_beta_schedule(timesteps):
    betas = jnp.linspace(1e-4, 2e-2, timesteps, dtype=jnp.float32)
    return jnp.cumprod(1.0 - betas)                          # index with t-1, t in [1, T]


def init_params(key):
    ks = jax.random.split(key, 6)
    s = 0.02
    # Layer-1 weight stacked to match the in-kernel LHS layout:
    # rows 0:100 = class rows, 100:128 = pad, 128:172 = dense rows, 172:176 = at/bidx/pad (zero).
    w1_type = s * jax.random.normal(ks[0], (NUM_CLASSES, HIDDEN), jnp.float32)
    w1_dense = s * jax.random.normal(ks[1], (D_DENSE, HIDDEN), jnp.float32)
    w1 = jnp.zeros((K_IN, HIDDEN), jnp.float32)
    w1 = w1.at[:NUM_CLASSES].set(w1_type)
    w1 = w1.at[NUM_CLASSES_PAD:NUM_CLASSES_PAD + D_DENSE].set(w1_dense)

    w2 = s * jax.random.normal(ks[2], (HIDDEN, HIDDEN), jnp.float32)

    wt = s * jax.random.normal(ks[3], (HIDDEN, NUM_CLASSES), jnp.float32)
    wf = s * jax.random.normal(ks[4], (HIDDEN, 3), jnp.float32)
    wl = s * jax.random.normal(ks[5], (HIDDEN, 9), jnp.float32)
    # Fused head: [pred_t | pred_f | lattice-contrib | pad]. wl folded in is exact by linearity:
    # mean_pool(ReLU(h2)) @ wl == mean_pool(ReLU(h2) @ wl).
    wh = jnp.zeros((HIDDEN, HEADS_PAD), jnp.float32)
    wh = wh.at[:, PRED_T_OFF:PRED_T_OFF + NUM_CLASSES].set(wt)
    wh = wh.at[:, PRED_F_OFF:PRED_F_OFF + 3].set(wf)
    wh = wh.at[:, LAT_OFF:LAT_OFF + 9].set(wl)

    return {
        "w1": w1.astype(jnp.bfloat16),
        "b1": jnp.zeros((1, HIDDEN), jnp.float32),
        "w2": w2.astype(jnp.bfloat16),
        "b2": jnp.zeros((1, HIDDEN), jnp.float32),
        "wh": wh.astype(jnp.bfloat16),
        "bh": jnp.zeros((1, HEADS_PAD), jnp.float32),
        "bl": jnp.zeros((1, 9), jnp.float32),     # lattice bias, added in the tiny JAX epilogue
    }


def crystal_diffusion_forward(params, batch, key, tile_n=1024):
    B = batch["num_graphs"]
    batch_idx = batch["batch"].astype(jnp.int32)     # (N,) graph index per atom
    num_atoms = batch["num_atoms"]                   # (B,)
    N = batch["frac_coords"].shape[0]

    k_t, k_nl, k_nf = jax.random.split(key, 3)

    # times = lat_scheduler.uniform_sample_t(batch_size)
    times = jax.random.randint(k_t, (B,), 1, TIMESTEPS + 1)
    time_emb = sinusoidal_time_embedding(times, TIME_DIM)               # (B, TIME_DIM)

    lattices = lattice_params_to_matrix(batch["lengths"], batch["angles"])   # (B, 3, 3)
    frac_coords = batch["frac_coords"]                                   # (N, 3)
    atom_types = (batch["atom_types"] - 1).astype(jnp.int32)             # (N,) 0..99

    alphas_cumprod = make_beta_schedule(TIMESTEPS)
    a_bar = alphas_cumprod[times - 1]                                    # (B,)
    sqrt_ab, sqrt_1mab = jnp.sqrt(a_bar), jnp.sqrt(1.0 - a_bar)

    # lat_ts.add_noise (continuous DDPM transition)
    rand_l = jax.random.normal(k_nl, lattices.shape, jnp.float32)
    input_l = sqrt_ab[:, None, None] * lattices + sqrt_1mab[:, None, None] * rand_l

    # coord_ts.add_noise (per-atom times via batch index; coords wrapped to [0, 1))
    # TODO(synk): true coord transition uses a wrapped-normal score target; simplified to noise target.
    rand_f = jax.random.normal(k_nf, frac_coords.shape, jnp.float32)
    ab_f, mab_f = sqrt_ab[batch_idx][:, None], sqrt_1mab[batch_idx][:, None]
    input_f = (ab_f * frac_coords + mab_f * rand_f) % 1.0
    tar_f = rand_f

    # Packed per-atom slab: dense features | atom_type | batch_idx | pad (exact small ints in bf16).
    feat = jnp.concatenate(
        [input_f, time_emb[batch_idx], input_l.reshape(B, 9)[batch_idx]],
        axis=-1)                                                         # (N, 44) f32

    # Pad atom axis to a multiple of 2*tile_n (2-way core split). Pad rows get batch_idx = -1.
    n_tiles = 2 * (-(-N // (2 * tile_n)))
    N_pad = n_tiles * tile_n
    pad = N_pad - N
    feat_p = jnp.pad(feat, ((0, pad), (0, 0)))
    at_p = jnp.pad(atom_types.astype(jnp.float32), (0, pad))[:, None]
    bidx_p = jnp.pad(batch_idx.astype(jnp.float32), (0, pad), constant_values=-1.0)[:, None]
    zpad = jnp.zeros((N_pad, D_IN - D_DENSE - 2), jnp.float32)
    xin = jnp.concatenate([feat_p, at_p, bidx_p, zpad], axis=-1).astype(jnp.bfloat16)  # (N_pad, 48)
    tarf_p = jnp.pad(tar_f, ((0, pad), (0, 0)))                          # (N_pad, 3) f32

    lat_part, sq_part = run_decoder_loss(xin, tarf_p, params, n_graphs=B, tile_n=tile_n)

    # Tiny JAX epilogue: combine per-core partials, finish mean-pool lattice head + losses.
    inv_na = 1.0 / jnp.maximum(num_atoms, 1).astype(jnp.float32)[:, None]     # (B, 1)
    pred_l = lat_part.sum(axis=0) * inv_na + params["bl"]                      # (B, 9)
    rand_l_flat = rand_l.reshape(B, 9)
    loss_lattice = jnp.mean((pred_l - rand_l_flat) ** 2)                       # lat_ts.get_mse_loss
    n_total = jnp.sum(num_atoms).astype(jnp.float32)
    loss_coord = sq_part.sum() / (3.0 * n_total)                               # coord_ts.get_mse_loss
    loss_type = 0.0
    # TODO(synk): cfg-dependent cost_type cross-entropy on pred_t not implemented (loss_t == 0.0
    # in the reference forward); pred_t columns are computed in-kernel but never materialized.
    loss = COST_LATTICE * loss_lattice + COST_COORD * loss_coord

    return {
        "loss": loss,
        "loss_lattice": loss_lattice,
        "loss_coord": loss_coord,
        "loss_type": loss_type,
    }


# ==================================== main ======================================

if __name__ == "__main__":
    key = jax.random.PRNGKey(0)
    k_param, k_batch, k_fwd = jax.random.split(key, 3)

    # Small synthetic "batch": 2 graphs x 96 atoms = 192 atoms total.
    # With tile_n=128 the atom axis pads to 256 -> grid (2, 1): one tile per (virtual) core,
    # exercising the parallel core split + padded-row masking.
    B, atoms_per_graph = 2, 96
    N = B * atoms_per_graph
    kb = jax.random.split(k_batch, 4)
    batch = {
        "num_graphs": B,
        "num_atoms": jnp.full((B,), atoms_per_graph, jnp.int32),
        "batch": jnp.repeat(jnp.arange(B, dtype=jnp.int32), atoms_per_graph),   # (N,)
        "lengths": 4.0 + jax.random.uniform(kb[0], (B, 3), jnp.float32),        # angstroms
        "angles": 90.0 + 5.0 * jax.random.normal(kb[1], (B, 3), jnp.float32),   # degrees
        "frac_coords": jax.random.uniform(kb[2], (N, 3), jnp.float32),
        "atom_types": jax.random.randint(kb[3], (N,), 1, NUM_CLASSES + 1),      # 1..100
    }

    params = init_params(k_param)
    out = crystal_diffusion_forward(params, batch, k_fwd, tile_n=128)
    jax.block_until_ready(out["loss"])

    assert out["loss"].shape == ()
    assert bool(jnp.isfinite(out["loss"]))
    assert bool(jnp.isfinite(out["loss_lattice"]))
    assert bool(jnp.isfinite(out["loss_coord"]))
    assert out["loss_type"] == 0.0
    print("KERNEL_OK")
</pallas_src>

<mosaic_0001>
module attributes {stable_mosaic.version = 11 : i64} {
  func.func @kernel(%arg0: i32, %arg1: i32, %arg2: memref<128x48xbf16, #tpu.memory_space<vmem>>, %arg3: memref<128x3xf32, #tpu.memory_space<vmem>>, %arg4: memref<176x128xbf16, #tpu.memory_space<vmem>>, %arg5: memref<1x128xf32, #tpu.memory_space<vmem>>, %arg6: memref<128x128xbf16, #tpu.memory_space<vmem>>, %arg7: memref<1x128xf32, #tpu.memory_space<vmem>>, %arg8: memref<128x128xbf16, #tpu.memory_space<vmem>>, %arg9: memref<1x128xf32, #tpu.memory_space<vmem>>, %arg10: memref<1x2x9xf32, #tpu.memory_space<vmem>>, %arg11: memref<1x1x1xf32, #tpu.memory_space<vmem>>) attributes {dimension_semantics = [#tpu.dimension_semantics<parallel>, #tpu.dimension_semantics<arbitrary>], iteration_bounds = array<i64: 2, 1>, scalar_prefetch = 0 : i64, scratch_operands = 0 : i64, tpu.core_type = #tpu.core_type<tc>, window_params = [{transform_indices = @transform_0, window_bounds = array<i64: 128, 48>}, {transform_indices = @transform_1, window_bounds = array<i64: 128, 3>}, {pipeline_mode = #tpu.pipeline_mode<synchronous>, transform_indices = @transform_2, window_bounds = array<i64: 176, 128>}, {pipeline_mode = #tpu.pipeline_mode<synchronous>, transform_indices = @transform_3, window_bounds = array<i64: 1, 128>}, {pipeline_mode = #tpu.pipeline_mode<synchronous>, transform_indices = @transform_4, window_bounds = array<i64: 128, 128>}, {pipeline_mode = #tpu.pipeline_mode<synchronous>, transform_indices = @transform_5, window_bounds = array<i64: 1, 128>}, {pipeline_mode = #tpu.pipeline_mode<synchronous>, transform_indices = @transform_6, window_bounds = array<i64: 128, 128>}, {pipeline_mode = #tpu.pipeline_mode<synchronous>, transform_indices = @transform_7, window_bounds = array<i64: 1, 128>}, {transform_indices = @transform_8, window_bounds = array<i64: 1, 2, 9>}, {transform_indices = @transform_9, window_bounds = array<i64: 1, 1, 1>}]} {
    %c0_i32 = arith.constant 0 : i32
    %0 = arith.cmpi eq, %arg1, %c0_i32 : i32
    %1 = arith.extui %0 : i1 to i32
    %c0_i32_0 = arith.constant 0 : i32
    %2 = arith.cmpi ne, %1, %c0_i32_0 : i32
    scf.if %2 {
      %cst_40 = arith.constant 0.000000e+00 : f32
      %95 = vector.broadcast %cst_40 : f32 to vector<1x2x9xf32>
      %c0_41 = arith.constant 0 : index
      %c0_42 = arith.constant 0 : index
      %c0_43 = arith.constant 0 : index
      %96 = vector.load %arg10[%c0_41, %c0_42, %c0_43] : memref<1x2x9xf32, #tpu.memory_space<vmem>>, vector<1x2x9xf32>
      tpu.vector_store %arg10[%c0_41, %c0_42, %c0_43], %95 {strides = array<i32>} : memref<1x2x9xf32, #tpu.memory_space<vmem>>, vector<1x2x9xf32>,
      %cst_44 = arith.constant 0.000000e+00 : f32
      %97 = vector.broadcast %cst_44 : f32 to vector<1x1x1xf32>
      %c0_45 = arith.constant 0 : index
      %c0_46 = arith.constant 0 : index
      %c0_47 = arith.constant 0 : index
      %98 = vector.load %arg11[%c0_45, %c0_46, %c0_47] : memref<1x1x1xf32, #tpu.memory_space<vmem>>, vector<1x1x1xf32>
      tpu.vector_store %arg11[%c0_45, %c0_46, %c0_47], %97 {strides = array<i32>} : memref<1x1x1xf32, #tpu.memory_space<vmem>>, vector<1x1x1xf32>,
    } else {
    }
    %c0 = arith.constant 0 : index
    %c0_1 = arith.constant 0 : index
    %3 = vector.load %arg2[%c0, %c0_1] : memref<128x48xbf16, #tpu.memory_space<vmem>>, vector<128x48xbf16>
    %4 = arith.extf %3 : vector<128x48xbf16> to vector<128x48xf32>
    %5 = vector.extract_strided_slice %4 {offsets = [0, 44], sizes = [128, 1], strides = [1, 1]} : vector<128x48xf32> to vector<128x1xf32>
    %6 = arith.fptosi %5 : vector<128x1xf32> to vector<128x1xi32>
    %7 = vector.extract_strided_slice %4 {offsets = [0, 45], sizes = [128, 1], strides = [1, 1]} : vector<128x48xf32> to vector<128x1xf32>
    %8 = tpu.iota {dimensions = array<i32: 1>} : vector<128x128xi32>
    %9 = vector.broadcast %6 : vector<128x1xi32> to vector<128x128xi32>
    %10 = arith.cmpi eq, %8, %9 : vector<128x128xi32>
    %11 = arith.extui %10 : vector<128x128xi1> to vector<128x128xi32>
    %12 = arith.sitofp %11 : vector<128x128xi32> to vector<128x128xf32>
    %13 = arith.truncf %12 : vector<128x128xf32> to vector<128x128xbf16>
    %14 = tpu.concatenate %13, %3 in 1 : vector<128x128xbf16>, vector<128x48xbf16> -> vector<128x176xbf16>
    %c0_2 = arith.constant 0 : index
    %c0_3 = arith.constant 0 : index
    %15 = vector.load %arg4[%c0_2, %c0_3] : memref<176x128xbf16, #tpu.memory_space<vmem>>, vector<176x128xbf16>
    %cst = arith.constant dense<0.000000e+00> : vector<128x128xf32>
    %16 = tpu.matmul %14, %15, %cst {dimension_numbers = #tpu.dot_dimension_numbers<[1], [0], [0], [1], [0, 0, 1, 1], [], []>} : vector<128x176xbf16>, vector<176x128xbf16>, vector<128x128xf32> -> vector<128x128xf32>
    %c0_4 = arith.constant 0 : index
    %c0_5 = arith.constant 0 : index
    %17 = vector.load %arg5[%c0_4, %c0_5] : memref<1x128xf32, #tpu.memory_space<vmem>>, vector<1x128xf32>
    %18 = vector.broadcast %17 : vector<1x128xf32> to vector<128x128xf32>
    %19 = arith.addf %16, %18 : vector<128x128xf32>
    %cst_6 = arith.constant 0.000000e+00 : f32
    %20 = vector.broadcast %cst_6 : f32 to vector<128x128xf32>
    %21 = arith.maximumf %19, %20 : vector<128x128xf32>
    %22 = arith.truncf %21 : vector<128x128xf32> to vector<128x128xbf16>
    %c0_7 = arith.constant 0 : index
    %c0_8 = arith.constant 0 : index
    %23 = vector.load %arg6[%c0_7, %c0_8] : memref<128x128xbf16, #tpu.memory_space<vmem>>, vector<128x128xbf16>
    %cst_9 = arith.constant dense<0.000000e+00> : vector<128x128xf32>
    %24 = tpu.matmul %22, %23, %cst_9 {dimension_numbers = #tpu.dot_dimension_numbers<[1], [0], [0], [1], [0, 0, 1, 1], [], []>} : vector<128x128xbf16>, vector<128x128xbf16>, vector<128x128xf32> -> vector<128x128xf32>
    %c0_10 = arith.constant 0 : index
    %c0_11 = arith.constant 0 : index
    %25 = vector.load %arg7[%c0_10, %c0_11] : memref<1x128xf32, #tpu.memory_space<vmem>>, vector<1x128xf32>
    %26 = vector.broadcast %25 : vector<1x128xf32> to vector<128x128xf32>
    %27 = arith.addf %24, %26 : vector<128x128xf32>
    %cst_12 = arith.constant 0.000000e+00 : f32
    %28 = vector.broadcast %cst_12 : f32 to vector<128x128xf32>
    %29 = arith.maximumf %27, %28 : vector<128x128xf32>
    %30 = arith.truncf %29 : vector<128x128xf32> to vector<128x128xbf16>
    %c0_13 = arith.constant 0 : index
    %c0_14 = arith.constant 0 : index
    %31 = vector.load %arg8[%c0_13, %c0_14] : memref<128x128xbf16, #tpu.memory_space<vmem>>, vector<128x128xbf16>
    %cst_15 = arith.constant dense<0.000000e+00> : vector<128x128xf32>
    %32 = tpu.matmul %30, %31, %cst_15 {dimension_numbers = #tpu.dot_dimension_numbers<[1], [0], [0], [1], [0, 0, 1, 1], [], []>} : vector<128x128xbf16>, vector<128x128xbf16>, vector<128x128xf32> -> vector<128x128xf32>
    %c0_16 = arith.constant 0 : index
    %c0_17 = arith.constant 0 : index
    %33 = vector.load %arg9[%c0_16, %c0_17] : memref<1x128xf32, #tpu.memory_space<vmem>>, vector<1x128xf32>
    %34 = vector.broadcast %33 : vector<1x128xf32> to vector<128x128xf32>
    %35 = arith.addf %32, %34 : vector<128x128xf32>
    %cst_18 = arith.constant 0.000000e+00 : f32
    %36 = vector.broadcast %cst_18 : f32 to vector<128x1xf32>
    %37 = arith.cmpf oge, %7, %36 : vector<128x1xf32>
    %38 = arith.extui %37 : vector<128x1xi1> to vector<128x1xi32>
    %39 = arith.sitofp %38 : vector<128x1xi32> to vector<128x1xf32>
    %40 = vector.extract_strided_slice %35 {offsets = [0, 100], sizes = [128, 3], strides = [1, 1]} : vector<128x128xf32> to vector<128x3xf32>
    %c0_19 = arith.constant 0 : index
    %c0_20 = arith.constant 0 : index
    %41 = vector.load %arg3[%c0_19, %c0_20] : memref<128x3xf32, #tpu.memory_space<vmem>>, vector<128x3xf32>
    %42 = arith.subf %40, %41 : vector<128x3xf32>
    %43 = vector.broadcast %39 : vector<128x1xf32> to vector<128x3xf32>
    %44 = arith.mulf %42, %43 : vector<128x3xf32>
    %c0_21 = arith.constant 0 : index
    %c0_22 = arith.constant 0 : index
    %c0_23 = arith.constant 0 : index
    %45 = vector.load %arg11[%c0_21, %c0_22, %c0_23] : memref<1x1x1xf32, #tpu.memory_space<vmem>>, vector<1x1x1xf32>
    %46 = arith.mulf %44, %44 : vector<128x3xf32>
    %47 = vector.shape_cast %46 : vector<128x3xf32> to vector<1x128x3xf32>
    %cst_24 = arith.constant dense<0.000000e+00> : vector<1xf32>
    %48 = vector.multi_reduction <add>, %47, %cst_24 [1, 2] : vector<1x128x3xf32> to vector<1xf32>
    %49 = vector.shape_cast %48 : vector<1xf32> to vector<1x1x1xf32>
    %50 = vector.extract %49[0, 0, 0] : f32 from vector<1x1x1xf32>
    %51 = vector.broadcast %50 : f32 to vector<1x1xf32>
    %52 = vector.shape_cast %51 : vector<1x1xf32> to vector<1x1x1xf32>
    %53 = arith.addf %45, %52 : vector<1x1x1xf32>
    %c0_25 = arith.constant 0 : index
    %c0_26 = arith.constant 0 : index
    %c0_27 = arith.constant 0 : index
    %54 = vector.load %arg11[%c0_25, %c0_26, %c0_27] : memref<1x1x1xf32, #tpu.memory_space<vmem>>, vector<1x1x1xf32>
    tpu.vector_store %arg11[%c0_25, %c0_26, %c0_27], %53 {strides = array<i32>} : memref<1x1x1xf32, #tpu.memory_space<vmem>>, vector<1x1x1xf32>,
    %55 = vector.extract_strided_slice %35 {offsets = [0, 103], sizes = [128, 9], strides = [1, 1]} : vector<128x128xf32> to vector<128x9xf32>
    %cst_28 = arith.constant 0.000000e+00 : f32
    %56 = vector.broadcast %cst_28 : f32 to vector<2x9xf32>
    %cst_29 = arith.constant 0.000000e+00 : f32
    %57 = vector.broadcast %cst_29 : f32 to vector<128x1xf32>
    %58 = arith.cmpf oeq, %7, %57 : vector<128x1xf32>
    %59 = arith.extui %58 : vector<128x1xi1> to vector<128x1xi32>
    %60 = arith.sitofp %59 : vector<128x1xi32> to vector<128x1xf32>
    %61 = vector.broadcast %60 : vector<128x1xf32> to vector<128x9xf32>
    %62 = arith.mulf %55, %61 : vector<128x9xf32>
    %cst_30 = arith.constant dense<0.000000e+00> : vector<9xf32>
    %63 = vector.multi_reduction <add>, %62, %cst_30 [0] : vector<128x9xf32> to vector<9xf32>
    %64 = vector.shape_cast %63 : vector<9xf32> to vector<1x9xf32>
    %65 = tpu.iota {dimensions = array<i32: 0>} : vector<2x1xi32>
    %c0_i32_31 = arith.constant 0 : i32
    %66 = vector.broadcast %c0_i32_31 : i32 to vector<2x1xi32>
    %67 = arith.cmpi eq, %65, %66 : vector<2x1xi32>
    %68 = arith.extui %67 : vector<2x1xi1> to vector<2x1xi32>
    %69 = arith.sitofp %68 : vector<2x1xi32> to vector<2x1xf32>
    %70 = vector.broadcast %69 : vector<2x1xf32> to vector<2x9xf32>
    %71 = vector.broadcast %64 : vector<1x9xf32> to vector<2x9xf32>
    %72 = arith.mulf %70, %71 : vector<2x9xf32>
    %73 = arith.addf %56, %72 : vector<2x9xf32>
    %cst_32 = arith.constant 1.000000e+00 : f32
    %74 = vector.broadcast %cst_32 : f32 to vector<128x1xf32>
    %75 = arith.cmpf oeq, %7, %74 : vector<128x1xf32>
    %76 = arith.extui %75 : vector<128x1xi1> to vector<128x1xi32>
    %77 = arith.sitofp %76 : vector<128x1xi32> to vector<128x1xf32>
    %78 = vector.broadcast %77 : vector<128x1xf32> to vector<128x9xf32>
    %79 = arith.mulf %55, %78 : vector<128x9xf32>
    %cst_33 = arith.constant dense<0.000000e+00> : vector<9xf32>
    %80 = vector.multi_reduction <add>, %79, %cst_33 [0] : vector<128x9xf32> to vector<9xf32>
    %81 = vector.shape_cast %80 : vector<9xf32> to vector<1x9xf32>
    %82 = tpu.iota {dimensions = array<i32: 0>} : vector<2x1xi32>
    %c1_i32 = arith.constant 1 : i32
    %83 = vector.broadcast %c1_i32 : i32 to vector<2x1xi32>
    %84 = arith.cmpi eq, %82, %83 : vector<2x1xi32>
    %85 = arith.extui %84 : vector<2x1xi1> to vector<2x1xi32>
    %86 = arith.sitofp %85 : vector<2x1xi32> to vector<2x1xf32>
    %87 = vector.broadcast %86 : vector<2x1xf32> to vector<2x9xf32>
    %88 = vector.broadcast %81 : vector<1x9xf32> to vector<2x9xf32>
    %89 = arith.mulf %87, %88 : vector<2x9xf32>
    %90 = arith.addf %73, %89 : vector<2x9xf32>
    %c0_34 = arith.constant 0 : index
    %c0_35 = arith.constant 0 : index
    %c0_36 = arith.constant 0 : index
    %91 = vector.load %arg10[%c0_34, %c0_35, %c0_36] : memref<1x2x9xf32, #tpu.memory_space<vmem>>, vector<1x2x9xf32>
    %92 = vector.shape_cast %90 : vector<2x9xf32> to vector<1x2x9xf32>
    %93 = arith.addf %91, %92 : vector<1x2x9xf32>
    %c0_37 = arith.constant 0 : index
    %c0_38 = arith.constant 0 : index
    %c0_39 = arith.constant 0 : index
    %94 = vector.load %arg10[%c0_37, %c0_38, %c0_39] : memref<1x2x9xf32, #tpu.memory_space<vmem>>, vector<1x2x9xf32>
    tpu.vector_store %arg10[%c0_37, %c0_38, %c0_39], %93 {strides = array<i32>} : memref<1x2x9xf32, #tpu.memory_space<vmem>>, vector<1x2x9xf32>,
    return
  }
  func.func @transform_0(%arg0: i32, %arg1: i32) -> (i32, i32) {
    %c1_i32 = arith.constant 1 : i32
    %0 = arith.muli %arg0, %c1_i32 : i32
    %1 = arith.addi %0, %arg1 : i32
    %c0_i32 = arith.constant 0 : i32
    %c0_i32_0 = arith.constant 0 : i32
    return %1, %c0_i32 : i32, i32
  }
  func.func @transform_1(%arg0: i32, %arg1: i32) -> (i32, i32) {
    %c1_i32 = arith.constant 1 : i32
    %0 = arith.muli %arg0, %c1_i32 : i32
    %1 = arith.addi %0, %arg1 : i32
    %c0_i32 = arith.constant 0 : i32
    %c0_i32_0 = arith.constant 0 : i32
    return %1, %c0_i32 : i32, i32
  }
  func.func @transform_2(%arg0: i32, %arg1: i32) -> (i32, i32) {
    %c0_i32 = arith.constant 0 : i32
    %c0_i32_0 = arith.constant 0 : i32
    %c0_i32_1 = arith.constant 0 : i32
    return %c0_i32, %c0_i32_0 : i32, i32
  }
  func.func @transform_3(%arg0: i32, %arg1: i32) -> (i32, i32) {
    %c0_i32 = arith.constant 0 : i32
    %c0_i32_0 = arith.constant 0 : i32
    %c0_i32_1 = arith.constant 0 : i32
    return %c0_i32, %c0_i32_0 : i32, i32
  }
  func.func @transform_4(%arg0: i32, %arg1: i32) -> (i32, i32) {
    %c0_i32 = arith.constant 0 : i32
    %c0_i32_0 = arith.constant 0 : i32
    %c0_i32_1 = arith.constant 0 : i32
    return %c0_i32, %c0_i32_0 : i32, i32
  }
  func.func @transform_5(%arg0: i32, %arg1: i32) -> (i32, i32) {
    %c0_i32 = arith.constant 0 : i32
    %c0_i32_0 = arith.constant 0 : i32
    %c0_i32_1 = arith.constant 0 : i32
    return %c0_i32, %c0_i32_0 : i32, i32
  }
  func.func @transform_6(%arg0: i32, %arg1: i32) -> (i32, i32) {
    %c0_i32 = arith.constant 0 : i32
    %c0_i32_0 = arith.constant 0 : i32
    %c0_i32_1 = arith.constant 0 : i32
    return %c0_i32, %c0_i32_0 : i32, i32
  }
  func.func @transform_7(%arg0: i32, %arg1: i32) -> (i32, i32) {
    %c0_i32 = arith.constant 0 : i32
    %c0_i32_0 = arith.constant 0 : i32
    %c0_i32_1 = arith.constant 0 : i32
    return %c0_i32, %c0_i32_0 : i32, i32
  }
  func.func @transform_8(%arg0: i32, %arg1: i32) -> (i32, i32, i32) {
    %c0_i32 = arith.constant 0 : i32
    %c0_i32_0 = arith.constant 0 : i32
    %c0_i32_1 = arith.constant 0 : i32
    return %arg0, %c0_i32, %c0_i32_0 : i32, i32, i32
  }
  func.func @transform_9(%arg0: i32, %arg1: i32) -> (i32, i32, i32) {
    %c0_i32 = arith.constant 0 : i32
    %c0_i32_0 = arith.constant 0 : i32
    %c0_i32_1 = arith.constant 0 : i32
    return %arg0, %c0_i32, %c0_i32_0 : i32, i32, i32
  }
}

</mosaic_0001>

<bundles_post_ra>
// kernel: tpu_custom_call.1
= control target key start
LH: loop header
LB: loop body
LE: loop exit
PB: predicated region body
PF: predicated region fallthrough
CT: control target
= control target key end

     0   :  { %15 = vsyncpa [#allocation3], 0  ;;  %s3362_s0 = inlined_call_operand.vmem [shape: bf16[256,48], index: 0, kind: input, shape index: {}]   ;;  %s3363_s1 = inlined_call_operand.vmem [shape: f32[256,3], index: 1, kind: input, shape index: {}]   ;;  %s3364_s2 = inlined_call_operand.vmem [shape: bf16[176,128], index: 2, kind: input, shape index: {}]   ;;  %s3365_s3 = inlined_call_operand.vmem [shape: f32[1,128], index: 3, kind: input, shape index: {}]   ;;  %s3366_s4 = inlined_call_operand.vmem [shape: bf16[128,128], index: 4, kind: input, shape index: {}]   ;;  %s3367_s5 = inlined_call_operand.vmem [shape: f32[1,128], index: 5, kind: input, shape index: {}]   ;;  %s3368_s6 = inlined_call_operand.vmem [shape: bf16[128,128], index: 6, kind: input, shape index: {}]   ;;  %s3369_s7 = inlined_call_operand.vmem [shape: f32[1,128], index: 7, kind: input, shape index: {}]   ;;  %s3370_s8 = inlined_call_operand.hbm [shape: f32[2,2,9], index: 8, kind: output, shape index: {0}]   ;;  %s3371_s9 = inlined_call_operand.vmem [shape: f32[2,1,1], index: 9, kind: output, shape index: {1}]  }
   0x1   :  { %17 = vsyncpa [#allocation3 + $0x1], 0  ;;  %s2702_s30 = smov 0   ;;  %s2704_s10 = smov 0  }
   0x2   :  { %s2706_s11 = smov 0   ;;  %s2708_s12 = smov 0  }
   0x3   :  { %s2710_s13 = smov 0   ;;  %s2712_s14 = smov 0  }
   0x4 LB: > { %s2061_s15 = sadd.s32 4294967295, %s2641_s14   ;;  %s2062_s16 = sadd.s32 4294967294, %s2641_s14   ;;  %s2641_s14 = sphi %s2712_s14, %s23_s14   ;;  %s2637_s13 = sphi %s2710_s13, %s3378_s13   ;;  %s2633_s12 = sphi %s2708_s12, %s3377_s12   ;;  %s2629_s11 = sphi %s2706_s11, %s3376_s11   ;;  %s2625_s10 = sphi %s2704_s10, %s3375_s10   ;;  %s2621_s30 = sphi %s2702_s30, %s3374_s30  }
   0x5   : > { %s35_s17 = sadd.s32 1, %s2637_s13  ;;  %s224_s18 = sadd.s32 1, %s2629_s11 }
   0x6   : > { %p37_p0 = scmp.ge.s32.totalorder %s35_s17, 2  ;;  %p234_p1 = scmp.ne.s32.totalorder %s2629_s11, %s2625_s10 }
   0x7   : > { %p235_p2 = scmp.eq.s32.totalorder %s2061_s15, 1  ;;  %p240_p3 = scmp.ne.s32.totalorder %s2625_s10, %s2621_s30 }
   0x8   : > { %s3380_s17 = smov (%p37_p0, %s35_s17), 0  ;;  %p241_p5 = scmp.eq.s32.totalorder %s2062_s16, 1 }
   0x9   : > { %p2742_p4 = por %p235_p2, %p234_p1  ;;  %s221_s20 = ssub.s32 %s2637_s13, %s3380_s17 }
   0xa   : > { %p2065_p6 = scmp.ge.s32.totalorder %s2641_s14, 1  ;;  %p222_p7 = scmp.eq.s32.totalorder %s221_s20, 0 }
   0xb   : > { %p2749_p8 = por %p241_p5, %p240_p3  ;;  %p325_p9 = scmp.lt.s32.totalorder %s2641_s14, 3 }
   0xc   : > { %s2755_s22 = scalar_select %p222_p7, %s2629_s11, %s224_s18  }
   0xd   : > { %p326_p10 = pnand %p2065_p6, %p325_p9 }
   0xe   : > { %s2067_s23 = sshll.u32 (!%p326_p10), %s2633_s12, 4  ;;  %v2520_v0 = vld [vmem:[%s3364_s2] sm:$0xff] (!%p326_p10)   ;;  %v2643_v1 = vmov (!%p326_p10), 44   ;;  %v2644_v2 = vmov (!%p326_p10), 0   ;;  %v2521_v3 = vld [vmem:[%s3364_s2 + $0x8] sm:$0xff] (!%p326_p10)   ;;  %v2522_v4 = vld [vmem:[%s3364_s2 + $0x10] sm:$0xff] (!%p326_p10)  }
   0xf   : > { %329 = sbr.rel (%p326_p10) target bundleno = 1217 (0x4c1), region = 52  ;;  %2397 = vset.pattern.permute.xlu1 (!%p326_p10), %v2643_v1  ;;  %2396 = vset.pattern.permute.xlu0 (!%p326_p10), %v2643_v1  ;;  %p373_p11 = scmp.lt.s32.totalorder (!%p326_p10), %s2067_s23, 31  ;;  %v2523_v19 = vld [vmem:[%s3364_s2 + $0x18] sm:$0xff] (!%p326_p10)   ;;  %v2524_v24 = vld [vmem:[%s3364_s2 + $0x20] sm:$0xff] (!%p326_p10)   ;;  %v2525_v33 = vld [vmem:[%s3364_s2 + $0x28] sm:$0xff] (!%p326_p10)   ;;  %vm688_vm0 = vcmask (!%p326_p10), 392192  }
  0x10   : > { %713 = vmatprep.subr.bf16.mxu0 (!%p326_p10), %v2644_v2  ;;  %v2526_v41 = vld [vmem:[%s3364_s2 + $0x30] sm:$0xff] (!%p326_p10)   ;;  %v2527_v53 = vld [vmem:[%s3364_s2 + $0x38] sm:$0xff] (!%p326_p10)   ;;  %v2528_v60 = vld [vmem:[%s3364_s2 + $0x40] sm:$0xff] (!%p326_p10)   ;;  %s2648_s27 = smov (!%p326_p10), 100   ;;  %s2649_s20 = smov (!%p326_p10), 28  }
  0x11   : > { %714 = vmatpush1.bf16.msra.mxu0 (!%p326_p10), %v2520_v0  ;;  %v2529_v1 = vld [vmem:[%s3364_s2 + $0x48] sm:$0xff] (!%p326_p10)   ;;  %s363_s24 = sand.u32 (!%p326_p10), 1, %s2625_s10   ;;  %p387_p12 = scmp.lt.s32.totalorder (!%p326_p10), %s2633_s12, 1 }
  0x12   : > { %715 = vmatprep.subr.bf16.mxu0 (!%p326_p10), %v2644_v2  ;;  %s2650_s29 = smov (!%p326_p10), 25   ;;  %s2200_s15 = sshll.u32 (!%p326_p10), %s2633_s12, 5 }
  0x15   : > { %716 = vmatpush1.bf16.msra.mxu0 (!%p326_p10), %v2521_v3 }
  0x16   : > { %s3382_s23 = smov (!%p373_p11, %s2067_s23), 31  ;;  %717 = vmatprep.subr.bf16.mxu0 %v2644_v2 }
  0x17   : > { %s2068_s28 = sshll.u32 %s3382_s23, 2 }
  0x18   : > { %s2772_s16 = scalar_lea.vmem %s3362_s0, %s2068_s28 }
  0x19   : > { %v2778_v5 = vld [vmem:[%s2772_s16 + $0x8] sm:$0xff]   ;;  %v399_v6 = vld [vmem:[%s2772_s16] sm:$0xff]   ;;  %v2782_v7 = vld [vmem:[%s2772_s16 + $0x10] sm:$0xff]   ;;  %718 = vmatpush1.bf16.msra.mxu0 %v2522_v4  ;;  %s388_s26 = scalar_select %p387_p12, %s2633_s12, 1 }
  0x1a   : > { %v2785_v8 = vunpack.c.l.bf16 %v2778_v5  ;;  %v2787_v9 = vunpack.c.l.bf16 %v399_v6  ;;  %v2790_v10 = vunpack.c.h.bf16 %v2778_v5  ;;  %v2792_v11 = vunpack.c.h.bf16 %v399_v6  ;;  %v2806_v18 = vld [vmem:[%s2772_s16 + $0x18] sm:$0xff]   ;;  %719 = vmatprep.subr.bf16.mxu0 %v2644_v2  ;;  %v2824_v29 = vld [vmem:[%s2772_s16 + $0x20] sm:$0xff]   ;;  %v2830_v32 = vld [vmem:[%s2772_s16 + $0x28] sm:$0xff]   ;;  %2107 = vmatprep.mubr.msk.bf16.mxu0 %vm688_vm0, %v399_v6  ;;  %s2651_s12 = smov [#allocation2]  }
  0x1b   : > { %v2796_v12 = vunpack.c.h.bf16 %v2782_v7  ;;  %v2799_v13 = vunpack.c.l.bf16 %v2782_v7  ;;  %v2813_v22 = vunpack.c.h.bf16 %v2806_v18  ;;  %v2816_v23 = vunpack.c.l.bf16 %v2806_v18  ;;  %v2842_v38 = vld [vmem:[%s2772_s16 + $0x30] sm:$0xff]   ;;  %v2867_v52 = vld [vmem:[%s2772_s16 + $0x38] sm:$0xff]   ;;  %s2070_s16 = sshll.u32 %s3382_s23, 3  ;;  %s3297_s28 = scalar_lea.vmem %s3371_s9, %s388_s26 }
  0x1c   : > { %v2303_v14 = vtrunc.f32 %v2785_v8  ;;  %v2299_v15 = vtrunc.f32 %v2787_v9  ;;  %v2305_v16 = vtrunc.f32 %v2790_v10  ;;  %v2301_v17 = vtrunc.f32 %v2792_v11  ;;  %v2530_v6 = vld [vmem:[%s3364_s2 + $0x50] sm:$0xff]   ;;  %s2991_s23 = scalar_lea.vmem %s3363_s1, %s2070_s16  ;;  %s2066_s16 = sshll.u32 %s363_s24, 1 }
  0x1d   : > { %v2309_v27 = vtrunc.f32 %v2796_v12  ;;  %v2307_v28 = vtrunc.f32 %v2799_v13  ;;  %720 = vmatpush1.bf16.msra.mxu0 %v2523_v19  ;;  %v2313_v30 = vtrunc.f32 %v2813_v22  ;;  %v2311_v31 = vtrunc.f32 %v2816_v23  ;;  %s3284_s25 = scalar_lea.vmem [#allocation2], %s2066_s16  ;;  %s3308_s26 = scalar_lea.hbm %s3370_s8, %s2200_s15 }
  0x1e   : > { %v2304_v20 = vcvt.f32.s32 %v2303_v14  ;;  %v2300_v21 = vcvt.f32.s32 %v2299_v15  ;;  %v2306_v25 = vcvt.f32.s32 %v2305_v16  ;;  %v2302_v26 = vcvt.f32.s32 %v2301_v17  ;;  %721 = vmatprep.subr.bf16.mxu0 %v2644_v2  ;;  %v2539_v14 = vld [vmem:[%s3366_s4] sm:$0xff]   ;;  %v2540_v15 = vld [vmem:[%s3366_s4 + $0x8] sm:$0xff]   ;;  %v2541_v16 = vld [vmem:[%s3366_s4 + $0x10] sm:$0xff]   ;;  %s1960_s18 = sshll.u32 %s3284_s25, 4  ;;  %s3310_s18 = int_to_ptr.vmem [resolvable:$true] %s1960_s18 }
  0x1f   : > { %v2310_v34 = vcvt.f32.s32 %v2309_v27  ;;  %v2308_v35 = vcvt.f32.s32 %v2307_v28  ;;  %v2836_v36 = vunpack.c.h.bf16 %v2824_v29  ;;  %v2839_v37 = vunpack.c.l.bf16 %v2824_v29  ;;  %2235 = vmatprep.subr.bf16.mxu1 %v2539_v14 }
  0x20   : > { %456 = vperm.xlu1 %2397, %v2304_v20   ;;  %450 = vperm.xlu0 %2396, %v2300_v21   ;;  %v2314_v39 = vcvt.f32.s32 %v2313_v30  ;;  %v2312_v40 = vcvt.f32.s32 %v2311_v31  ;;  %v2851_v44 = vunpack.c.h.bf16 %v2830_v32  ;;  %v2854_v45 = vunpack.c.l.bf16 %v2830_v32 }
  0x21   : > { %722 = vmatpush1.bf16.msra.mxu0 %v2524_v24  ;;  %v2317_v42 = vtrunc.f32 %v2836_v36  ;;  %v2315_v43 = vtrunc.f32 %v2839_v37  ;;  %v2859_v46 = vunpack.c.h.bf16 %v2842_v38  ;;  %v2862_v47 = vunpack.c.l.bf16 %v2842_v38  ;;  %2236 = vmatpush3.bf16.msra.mxu1 %v2539_v14 }
  0x22   : > { %723 = vmatprep.subr.bf16.mxu0 %v2644_v2  ;;  %v2321_v50 = vtrunc.f32 %v2851_v44  ;;  %v2319_v51 = vtrunc.f32 %v2854_v45  ;;  %v2874_v54 = vunpack.c.h.bf16 %v2867_v52  ;;  %v2877_v55 = vunpack.c.l.bf16 %v2867_v52  ;;  %2237 = vmatprep.subr.bf16.mxu1 %v2540_v15 }
  0x23   : > { %v2318_v48 = vcvt.f32.s32 %v2317_v42  ;;  %v2316_v49 = vcvt.f32.s32 %v2315_v43  ;;  %v2325_v58 = vtrunc.f32 %v2859_v46  ;;  %v2323_v59 = vtrunc.f32 %v2862_v47  ;;  %v2547_v42 = vld [vmem:[%s3368_s6] sm:$0xff]  }
  0x24   : > { %459 = vperm.xlu1 %2397, %v2306_v25   ;;  %453 = vperm.xlu0 %2396, %v2302_v26   ;;  %v2322_v56 = vcvt.f32.s32 %v2321_v50  ;;  %v2320_v57 = vcvt.f32.s32 %v2319_v51  ;;  %v2329_v63 = vtrunc.f32 %v2874_v54  ;;  %v2327_v0 = vtrunc.f32 %v2877_v55  ;;  %v2940_v43 = vld [vmem:[%s3365_s3] ss:$0 sm:$0xff] }
  0x25   : > { %724 = vmatpush1.bf16.msra.mxu0 %v2525_v33  ;;  %v2326_v61 = vcvt.f32.s32 %v2325_v58  ;;  %v2324_v62 = vcvt.f32.s32 %v2323_v59  ;;  %2238 = vmatpush3.bf16.msra.mxu1 %v2540_v15  ;;  %v447_v17 = vlaneseq  ;;  %v2645_v25 = vmov 1.0|1.0  }
  0x26   : > { %725 = vmatprep.subr.bf16.mxu0 %v2644_v2  ;;  %v2330_v3 = vcvt.f32.s32 %v2329_v63  ;;  %v2328_v4 = vcvt.f32.s32 %v2327_v0  ;;  %2239 = vmatprep.subr.bf16.mxu1 %v2541_v16 }
  0x27   : > { %v448_v20 = vand.u32 127, %v447_v17 }
  0x28   : > { %465 = vperm.xlu1 %2397, %v2310_v34   ;;  %462 = vperm.xlu0 %2396, %v2308_v35  }
  0x29   : > { %726 = vmatpush1.bf16.msra.mxu0 %v2526_v41  ;;  %2240 = vmatpush3.bf16.msra.mxu1 %v2541_v16  ;;  %v2546_v41 = vld [vmem:[%s3366_s4 + $0x38] sm:$0xff]  }
  0x2a   : > { %727 = vmatprep.subr.bf16.mxu0 %v2644_v2 }
  0x2c   : > { %471 = vperm.xlu1 %2397, %v2314_v39   ;;  %468 = vperm.xlu0 %2396, %v2312_v40   ;;  %v2545_v40 = vld [vmem:[%s3366_s4 + $0x30] sm:$0xff]  }
  0x2d   : > { %728 = vmatpush1.bf16.msra.mxu0 %v2527_v53 }
  0x2e   : > { %729 = vmatprep.subr.bf16.mxu0 %v2644_v2 }
  0x30   : > { %477 = vperm.xlu1 %2397, %v2318_v48   ;;  %474 = vperm.xlu0 %2396, %v2316_v49  }
  0x31   : > { %730 = vmatpush1.bf16.msra.mxu0 %v2528_v60 }
  0x32   : > { %731 = vmatprep.subr.bf16.mxu0 %v2644_v2 }
  0x34   : > { %483 = vperm.xlu1 %2397, %v2322_v56   ;;  %480 = vperm.xlu0 %2396, %v2320_v57  }
  0x35   : > { %732 = vmatpush1.bf16.msra.mxu0 %v2529_v1 }
  0x36   : > { %733 = vmatprep.subr.bf16.mxu0 %v2644_v2  ;;  %v2542_v2 = vld [vmem:[%s3366_s4 + $0x18] sm:$0xff]  }
  0x37   : > { %2241 = vmatprep.subr.bf16.mxu1 %v2542_v2 }
  0x38   : > { %489 = vperm.xlu1 %2397, %v2326_v61   ;;  %486 = vperm.xlu0 %2396, %v2324_v62  }
  0x39   : > { %734 = vmatpush1.bf16.msra.mxu0 %v2530_v6  ;;  %2242 = vmatpush3.bf16.msra.mxu1 %v2542_v2  ;;  %v2548_v6 = vld [vmem:[%s3368_s6 + $0x8] sm:$0xff]  }
  0x3c   : > { %495 = vperm.xlu1 %2397, %v2330_v3   ;;  %492 = vperm.xlu0 %2396, %v2328_v4  }
  0x9f   : > { %v451_v19 = vpop.permute.xlu0 %450  ;;  %v457_v24 = vpop.permute.xlu1 %456 }
  0xa0   : > { %vm497_vm2 = vcmp.eq.s32.totalorder %v448_v20, %v451_v19  ;;  %vm499_vm4 = vcmp.eq.s32.totalorder %v448_v20, %v457_v24 }
  0xa3   : > { %v454_v21 = vpop.permute.xlu0 %453  ;;  %v460_v26 = vpop.permute.xlu1 %459 }
  0xa4   : > { %vm498_vm1 = vcmp.eq.s32.totalorder %v448_v20, %v454_v21  ;;  %vm500_vm5 = vcmp.eq.s32.totalorder %v448_v20, %v460_v26  ;;  %v2549_v21 = vld [vmem:[%s3368_s6 + $0x10] sm:$0xff]  }
  0xa5   : > { %vm2108_vm3 = vmpackc.low %vm498_vm1, %vm497_vm2 }
  0xa6   : > { %2109 = vmatmul.mubr.msk.bf16.vlgmr.msra.gmra.mrb[0].mxu0 %vm2108_vm3, %v2645_v25  ;;  %vm2111_vm6 = vmpackc.low %vm500_vm5, %vm499_vm4 }
  0xa7   : > { %2110 = vmatprep.mubr.msk.bf16.mxu0 %vm688_vm0, %v2778_v5  ;;  %v466_v27 = vpop.permute.xlu1 %465  ;;  %v463_v28 = vpop.permute.xlu0 %462 }
  0xa8   : > { %vm502_vm7 = vcmp.eq.s32.totalorder %v448_v20, %v466_v27  ;;  %vm501_vm8 = vcmp.eq.s32.totalorder %v448_v20, %v463_v28  ;;  %v2550_v27 = vld [vmem:[%s3368_s6 + $0x18] sm:$0xff]  }
  0xa9   : > { %vm2114_vm9 = vmpackc.low %vm502_vm7, %vm501_vm8 }
  0xab   : > { %v472_v30 = vpop.permute.xlu1 %471  ;;  %v469_v31 = vpop.permute.xlu0 %468 }
  0xac   : > { %vm504_vm10 = vcmp.eq.s32.totalorder %v448_v20, %v472_v30  ;;  %vm503_vm11 = vcmp.eq.s32.totalorder %v448_v20, %v469_v31 }
  0xad   : > { %vm2117_vm12 = vmpackc.low %vm504_vm10, %vm503_vm11  ;;  %vm1195_vm10 = vcmp.ge.f32.partialorder %v2792_v11, 0.0  ;;  %vm1196_vm11 = vcmp.ge.f32.partialorder %v2785_v8, 0.0 }
  0xae   : > { %2112 = vmatmul.mubr.msk.bf16.gmra.mrb[4].mxu0 %vm2111_vm6, %v2645_v25 }
  0xaf   : > { %2113 = vmatprep.mubr.msk.bf16.mxu0 %vm688_vm0, %v2782_v7  ;;  %v478_v5 = vpop.permute.xlu1 %477  ;;  %v475_v33 = vpop.permute.xlu0 %474 }
  0xb0   : > { %vm506_vm13 = vcmp.eq.s32.totalorder %v448_v20, %v478_v5  ;;  %vm505_vm14 = vcmp.eq.s32.totalorder %v448_v20, %v475_v33 }
  0xb1   : > { %vm2120_vm15 = vmpackc.low %vm506_vm13, %vm505_vm14  ;;  %vm1198_vm13 = vcmp.ge.f32.partialorder %v2799_v13, 0.0  ;;  %vm1199_vm14 = vcmp.ge.f32.partialorder %v2796_v12, 0.0 }
  0xb3   : > { %v484_v7 = vpop.permute.xlu1 %483  ;;  %v481_v34 = vpop.permute.xlu0 %480 }
  0xb4   : > { %vm508_vm1 = vcmp.eq.s32.totalorder %v448_v20, %v484_v7  ;;  %vm507_vm2 = vcmp.eq.s32.totalorder %v448_v20, %v481_v34  ;;  %v2551_v34 = vld [vmem:[%s3368_s6 + $0x20] sm:$0xff]  }
  0xb5   : > { %vm2123_vm3 = vmpackc.low %vm508_vm1, %vm507_vm2  ;;  %vm1201_vm1 = vcmp.ge.f32.partialorder %v2813_v22, 0.0  ;;  %vm1202_vm2 = vcmp.ge.f32.partialorder %v2839_v37, 0.0 }
  0xb6   : > { %2115 = vmatmul.mubr.msk.bf16.gmra.mrb[8].mxu0 %vm2114_vm9, %v2645_v25 }
  0xb7   : > { %2116 = vmatprep.mubr.msk.bf16.mxu0 %vm688_vm0, %v2806_v18  ;;  %v490_v18 = vpop.permute.xlu1 %489  ;;  %v487_v35 = vpop.permute.xlu0 %486 }
  0xb8   : > { %vm510_vm4 = vcmp.eq.s32.totalorder %v448_v20, %v490_v18  ;;  %vm509_vm5 = vcmp.eq.s32.totalorder %v448_v20, %v487_v35 }
  0xb9   : > { %vm2126_vm6 = vmpackc.low %vm510_vm4, %vm509_vm5  ;;  %vm1204_vm4 = vcmp.ge.f32.partialorder %v2854_v45, 0.0  ;;  %vm1205_vm5 = vcmp.ge.f32.partialorder %v2851_v44, 0.0 }
  0xbb   : > { %v493_v39 = vpop.permute.xlu0 %492 }
  0xbc   : > { %vm511_vm8 = vcmp.eq.s32.totalorder %v448_v20, %v493_v39  ;;  %v2552_v39 = vld [vmem:[%s3368_s6 + $0x28] sm:$0xff]  }
  0xbe   : > { %2118 = vmatmul.mubr.msk.bf16.gmra.mrb[12].mxu0 %vm2117_vm12, %v2645_v25  ;;  %vm1197_vm12 = vcmp.ge.f32.partialorder %v2790_v10, 0.0 }
  0xbf   : > { %2119 = vmatprep.mubr.msk.bf16.mxu0 %vm688_vm0, %v2824_v29  ;;  %v496_v29 = vpop.permute.xlu1 %495 }
  0xc0   : > { %vm512_vm7 = vcmp.eq.s32.totalorder %v448_v20, %v496_v29 }
  0xc1   : > { %vm2129_vm9 = vmpackc.low %vm512_vm7, %vm511_vm8  ;;  %vm1207_vm7 = vcmp.ge.f32.partialorder %v2859_v46, 0.0  ;;  %vm1208_vm8 = vcmp.ge.f32.partialorder %v2877_v55, 0.0 }
  0xc6   : > { %2121 = vmatmul.mubr.msk.bf16.gmra.mrb[16].mxu0 %vm2120_vm15, %v2645_v25  ;;  %vm1200_vm15 = vcmp.ge.f32.partialorder %v2816_v23, 0.0 }
  0xc7   : > { %2122 = vmatprep.mubr.msk.bf16.mxu0 %vm688_vm0, %v2830_v32  ;;  %v2543_v32 = vld [vmem:[%s3366_s4 + $0x20] sm:$0xff]  }
  0xc8   : > { %2243 = vmatprep.subr.bf16.mxu1 %v2543_v32 }
  0xc9   : > { %2244 = vmatpush3.bf16.msra.mxu1 %v2543_v32 }
  0xce   : > { %2124 = vmatmul.mubr.msk.bf16.gmra.mrb[20].mxu0 %vm2123_vm3, %v2645_v25  ;;  %vm1203_vm3 = vcmp.ge.f32.partialorder %v2836_v36, 0.0 }
  0xcf   : > { %2125 = vmatprep.mubr.msk.bf16.mxu0 %vm688_vm0, %v2842_v38  ;;  %v2544_v38 = vld [vmem:[%s3366_s4 + $0x28] sm:$0xff]  }
  0xd0   : > { %2245 = vmatprep.subr.bf16.mxu1 %v2544_v38 }
  0xd1   : > { %2246 = vmatpush3.bf16.msra.mxu1 %v2544_v38 }
  0xd2   : > { %2247 = vmatprep.subr.bf16.mxu1 %v2545_v40 }
  0xd5   : > { %2248 = vmatpush3.bf16.msra.mxu1 %v2545_v40 }
  0xd6   : > { %2127 = vmatmul.mubr.msk.bf16.gmra.mrb[24].mxu0 %vm2126_vm6, %v2645_v25  ;;  %2249 = vmatprep.subr.bf16.mxu1 %v2546_v41  ;;  %vm1206_vm6 = vcmp.ge.f32.partialorder %v2862_v47, 0.0 }
  0xd7   : > { %2128 = vmatprep.mubr.msk.bf16.mxu0 %vm688_vm0, %v2867_v52  ;;  %vm1194_vm0 = vcmp.ge.f32.partialorder %v2787_v9, 0.0 }
  0xd9   : > { %2250 = vmatpush3.bf16.msra.mxu1 %v2546_v41 }
  0xda   : > { %2267 = vmatprep.subr.bf16.mxu1 %v2547_v42 }
  0xde   : > { %2130 = vmatmul.mubr.msk.bf16.gmra.mrb[28].mxu0 %vm2129_vm9, %v2645_v25  ;;  %vm1209_vm9 = vcmp.ge.f32.partialorder %v2874_v54, 0.0 }
 0x179   : > { %v747_v48 = vpop.f32.mrb[0].mxu0 }
 0x17a   : > { %v748_v49 = vadd.f32 %v2940_v43, %v747_v48  ;;  %v749_v50 = vpop.f32.mrb[1].mxu0 }
 0x17b   : > { %v750_v51 = vpop.f32.mrb[2].mxu0 }
 0x17c   : > { %v751_v52 = vadd.f32 %v2940_v43, %v750_v51  ;;  %v752_v53 = vpop.f32.mrb[3].mxu0  ;;  %v810_v56 = vmax.f32 %v748_v49, 0.0 }
 0x17e   : > { %v811_v57 = vmax.f32 %v751_v52, 0.0 }
 0x180   : > { %v826_v58 = vpack.c.bf16 %v811_v57, %v810_v56 }
 0x181   : > { %v755_v59 = vpop.f32.mrb[4].mxu0 }
 0x182   : > { %v756_v60 = vadd.f32 %v2940_v43, %v755_v59  ;;  %v757_v61 = vpop.f32.mrb[5].mxu0  ;;  %2251 = vmatprep.mubr.bf16.mxu1 %v826_v58 }
 0x183   : > { %v758_v62 = vpop.f32.mrb[6].mxu0 }
 0x184   : > { %v759_v63 = vadd.f32 %v2940_v43, %v758_v62  ;;  %v760_v0 = vpop.f32.mrb[7].mxu0  ;;  %v812_v1 = vmax.f32 %v756_v60, 0.0 }
 0x186   : > { %v813_v3 = vmax.f32 %v759_v63, 0.0 }
 0x188   : > { %v827_v4 = vpack.c.bf16 %v813_v3, %v812_v1 }
 0x189   : > { %v763_v14 = vpop.f32.mrb[8].mxu0 }
 0x18a   : > { %v764_v15 = vadd.f32 %v2940_v43, %v763_v14  ;;  %v765_v16 = vpop.f32.mrb[9].mxu0  ;;  %2252 = vmatmul.mubr.bf16.vlgmr.msra.gmra.mrb[0].mxu1 %v827_v4 }
 0x18b   : > { %v766_v2 = vpop.f32.mrb[10].mxu0  ;;  %2268 = vmatpush3.bf16.msra.mxu1 %v2547_v42 }
 0x18c   : > { %v767_v19 = vadd.f32 %v2940_v43, %v766_v2  ;;  %v768_v20 = vpop.f32.mrb[11].mxu0  ;;  %2269 = vmatprep.subr.bf16.mxu1 %v2548_v6  ;;  %v814_v24 = vmax.f32 %v764_v15, 0.0 }
 0x18e   : > { %v815_v25 = vmax.f32 %v767_v19, 0.0 }
 0x18f   : > { %2270 = vmatpush3.bf16.msra.mxu1 %v2548_v6 }
 0x190   : > { %v828_v26 = vpack.c.bf16 %v815_v25, %v814_v24  ;;  %2271 = vmatprep.subr.bf16.mxu1 %v2549_v21 }
 0x191   : > { %v771_v28 = vpop.f32.mrb[12].mxu0 }
 0x192   : > { %v772_v30 = vadd.f32 %v2940_v43, %v771_v28  ;;  %v773_v31 = vpop.f32.mrb[13].mxu0  ;;  %2255 = vmatprep.mubr.bf16.mxu1 %v828_v26 }
 0x193   : > { %v774_v5 = vpop.f32.mrb[14].mxu0  ;;  %2272 = vmatpush3.bf16.msra.mxu1 %v2549_v21  ;;  %v2554_v31 = vld [vmem:[%s3368_s6 + $0x38] sm:$0xff]  }
 0x194   : > { %v775_v33 = vadd.f32 %v2940_v43, %v774_v5  ;;  %v776_v7 = vpop.f32.mrb[15].mxu0  ;;  %2273 = vmatprep.subr.bf16.mxu1 %v2550_v27  ;;  %v816_v18 = vmax.f32 %v772_v30, 0.0  ;;  %v2553_v30 = vld [vmem:[%s3368_s6 + $0x30] sm:$0xff]   ;;  %v2647_v5 = vmov 0.0  }
 0x195   : > { %v2150_v7 = vsel %vm1195_vm10, 1.0, %v2647_v5  ;;  %vm1561_vm10 = vcmp.eq.f32.partialorder %v2792_v11, 0.0 }
 0x196   : > { %v817_v35 = vmax.f32 %v775_v33, 0.0  ;;  %v2149_v33 = vsel %vm1194_vm0, 1.0, %v2647_v5  ;;  %vm1560_vm0 = vcmp.eq.f32.partialorder %v2787_v9, 0.0 }
 0x197   : > { %2274 = vmatpush3.bf16.msra.mxu1 %v2550_v27 }
 0x198   : > { %v829_v29 = vpack.c.bf16 %v817_v35, %v816_v18  ;;  %2275 = vmatprep.subr.bf16.mxu1 %v2551_v34  ;;  %v2151_v18 = vsel %vm1196_vm11, 1.0, %v2647_v5  ;;  %v2152_v35 = vsel %vm1197_vm12, 1.0, %v2647_v5  ;;  %vm1749_vm11 = vcmp.eq.f32.partialorder %v2787_v9, 1.0 }
 0x199   : > { %v779_v32 = vpop.f32.mrb[16].mxu0  ;;  %vm1750_vm12 = vcmp.eq.f32.partialorder %v2792_v11, 1.0 }
 0x19a   : > { %v780_v38 = vadd.f32 %v2940_v43, %v779_v32  ;;  %v781_v40 = vpop.f32.mrb[17].mxu0  ;;  %2256 = vmatmul.mubr.bf16.gmra.mrb[4].mxu1 %v829_v29  ;;  %v2405_v29 = vpack.i.bf16 %v2152_v35, %v2151_v18  ;;  %v1242_v32 = vld [vmem:[%s2991_s23] sm:$0xff] }
 0x19b   : > { %v782_v41 = vpop.f32.mrb[18].mxu0  ;;  %2276 = vmatpush3.bf16.msra.mxu1 %v2551_v34  ;;  %v2399_v34 = vpack.i.bf16 %v2150_v7, %v2149_v33  ;;  %v2154_v40 = vsel %vm1199_vm14, 1.0, %v2647_v5  ;;  %vm1751_vm14 = vcmp.eq.f32.partialorder %v2785_v8, 1.0 }
 0x19c   : > { %v783_v42 = vadd.f32 %v2940_v43, %v782_v41  ;;  %v784_v48 = vpop.f32.mrb[19].mxu0  ;;  %2277 = vmatprep.subr.bf16.mxu1 %v2552_v39  ;;  %v818_v49 = vmax.f32 %v780_v38, 0.0  ;;  %v2153_v38 = vsel %vm1198_vm13, 1.0, %v2647_v5  ;;  %v1244_v41 = vld [vmem:[%s2991_s23 + $0x10] sm:$0xff]  ;;  %vm1562_vm13 = vcmp.eq.f32.partialorder %v2785_v8, 0.0 }
 0x19d   : > { %v2155_v48 = vsel %vm1200_vm15, 1.0, %v2647_v5  ;;  %vm1563_vm15 = vcmp.eq.f32.partialorder %v2790_v10, 0.0  ;;  %v2167_v11 = vsel %vm1562_vm13, 1.0, %v2647_v5  ;;  %vm1570_vm13 = vcmp.eq.f32.partialorder %v2854_v45, 0.0 }
 0x19e   : > { %v819_v50 = vmax.f32 %v783_v42, 0.0  ;;  %v2410_v42 = vpack.i.bf16 %v2154_v40, %v2153_v38  ;;  %v2168_v8 = vsel %vm1563_vm15, 1.0, %v2647_v5  ;;  %vm1571_vm15 = vcmp.eq.f32.partialorder %v2851_v44, 0.0 }
 0x19f   : > { %2278 = vmatpush3.bf16.msra.mxu1 %v2552_v39  ;;  %v1243_v39 = vld [vmem:[%s2991_s23 + $0x8] sm:$0xff] }
 0x1a0   : > { %v830_v51 = vpack.c.bf16 %v819_v50, %v818_v49  ;;  %2279 = vmatprep.subr.bf16.mxu1 %v2553_v30  ;;  %v2156_v49 = vsel %vm1201_vm1, 1.0, %v2647_v5  ;;  %vm1752_vm1 = vcmp.eq.f32.partialorder %v2790_v10, 1.0 }
 0x1a1   : > { %v787_v52 = vpop.f32.mrb[20].mxu0  ;;  %v2415_v50 = vpack.i.bf16 %v2156_v49, %v2155_v48 }
 0x1a2   : > { %v788_v53 = vadd.f32 %v2940_v43, %v787_v52  ;;  %v789_v56 = vpop.f32.mrb[21].mxu0  ;;  %2259 = vmatprep.mubr.bf16.mxu1 %v830_v51  ;;  %v1245_v51 = vld [vmem:[%s2991_s23 + $0x18] sm:$0xff]  ;;  %v1247_v52 = vld [vmem:[%s2991_s23 + $0x28] sm:$0xff] }
 0x1a3   : > { %v790_v57 = vpop.f32.mrb[22].mxu0  ;;  %2280 = vmatpush3.bf16.msra.mxu1 %v2553_v30  ;;  %v2157_v56 = vsel %vm1202_vm2, 1.0, %v2647_v5  ;;  %vm1564_vm2 = vcmp.eq.f32.partialorder %v2799_v13, 0.0 }
 0x1a4   : > { %v791_v58 = vadd.f32 %v2940_v43, %v790_v57  ;;  %v792_v59 = vpop.f32.mrb[23].mxu0  ;;  %v820_v60 = vmax.f32 %v788_v53, 0.0  ;;  %2281 = vmatprep.subr.bf16.mxu1 %v2554_v31  ;;  %v1246_v53 = vld [vmem:[%s2991_s23 + $0x20] sm:$0xff]  ;;  %v2158_v57 = vsel %vm1203_vm3, 1.0, %v2647_v5  ;;  %vm1753_vm3 = vcmp.eq.f32.partialorder %v2799_v13, 1.0 }
 0x1a5   : > { %v2420_v59 = vpack.i.bf16 %v2158_v57, %v2157_v56  ;;  %v2169_v10 = vsel %vm1564_vm2, 1.0, %v2647_v5  ;;  %vm1572_vm2 = vcmp.eq.f32.partialorder %v2862_v47, 0.0 }
 0x1a6   : > { %v821_v61 = vmax.f32 %v791_v58, 0.0  ;;  %v1248_v58 = vld [vmem:[%s2991_s23 + $0x30] sm:$0xff] }
 0x1a7   : > { %2282 = vmatpush3.bf16.msra.mxu1 %v2554_v31 }
 0x1a8   : > { %v831_v62 = vpack.c.bf16 %v821_v61, %v820_v60  ;;  %v2159_v60 = vsel %vm1204_vm4, 1.0, %v2647_v5  ;;  %v2160_v61 = vsel %vm1205_vm5, 1.0, %v2647_v5  ;;  %vm1565_vm4 = vcmp.eq.f32.partialorder %v2796_v12, 0.0 }
 0x1a9   : > { %v795_v63 = vpop.f32.mrb[24].mxu0  ;;  %vm1754_vm5 = vcmp.eq.f32.partialorder %v2796_v12, 1.0  ;;  %v2170_v13 = vsel %vm1565_vm4, 1.0, %v2647_v5  ;;  %vm1573_vm4 = vcmp.eq.f32.partialorder %v2859_v46, 0.0 }
 0x1aa   : > { %v796_v0 = vadd.f32 %v2940_v43, %v795_v63  ;;  %v797_v1 = vpop.f32.mrb[25].mxu0  ;;  %2260 = vmatmul.mubr.bf16.gmra.mrb[8].mxu1 %v831_v62  ;;  %v2425_v62 = vpack.i.bf16 %v2160_v61, %v2159_v60  ;;  %v1249_v63 = vld [vmem:[%s2991_s23 + $0x38] sm:$0xff] }
 0x1ab   : > { %v798_v3 = vpop.f32.mrb[26].mxu0  ;;  %v1250_v1 = vld [vmem:[%s2991_s23 + $0x40] sm:$0xff] }
 0x1ac   : > { %v799_v4 = vadd.f32 %v2940_v43, %v798_v3  ;;  %v800_v6 = vpop.f32.mrb[27].mxu0  ;;  %v822_v14 = vmax.f32 %v796_v0, 0.0  ;;  %v1251_v0 = vld [vmem:[%s2991_s23 + $0x48] sm:$0xff]  ;;  %v2161_v3 = vsel %vm1206_vm6, 1.0, %v2647_v5  ;;  %vm1566_vm6 = vcmp.eq.f32.partialorder %v2816_v23, 0.0 }
 0x1ad   : > { %v1252_v6 = vld [vmem:[%s2991_s23 + $0x50] sm:$0xff]  ;;  %v2171_v12 = vsel %vm1566_vm6, 1.0, %v2647_v5  ;;  %vm1574_vm6 = vcmp.eq.f32.partialorder %v2877_v55, 0.0 }
 0x1ae   : > { %v823_v15 = vmax.f32 %v799_v4, 0.0  ;;  %v2162_v4 = vsel %vm1207_vm7, 1.0, %v2647_v5  ;;  %vm1755_vm7 = vcmp.eq.f32.partialorder %v2816_v23, 1.0 }
 0x1b0   : > { %v832_v16 = vpack.c.bf16 %v823_v15, %v822_v14  ;;  %v2430_v14 = vpack.i.bf16 %v2162_v4, %v2161_v3  ;;  %v2163_v15 = vsel %vm1208_vm8, 1.0, %v2647_v5  ;;  %vm1567_vm8 = vcmp.eq.f32.partialorder %v2813_v22, 0.0 }
 0x1b1   : > { %v803_v2 = vpop.f32.mrb[28].mxu0  ;;  %v2172_v23 = vsel %vm1567_vm8, 1.0, %v2647_v5  ;;  %vm1575_vm8 = vcmp.eq.f32.partialorder %v2874_v54, 0.0 }
 0x1b2   : > { %v804_v19 = vadd.f32 %v2940_v43, %v803_v2  ;;  %v805_v20 = vpop.f32.mrb[29].mxu0  ;;  %2263 = vmatprep.mubr.bf16.mxu1 %v832_v16  ;;  %v2164_v16 = vsel %vm1209_vm9, 1.0, %v2647_v5  ;;  %vm1756_vm9 = vcmp.eq.f32.partialorder %v2813_v22, 1.0 }
 0x1b3   : > { %v806_v21 = vpop.f32.mrb[30].mxu0  ;;  %v2435_v2 = vpack.i.bf16 %v2164_v16, %v2163_v15  ;;  %v1255_v20 = vld [vmem:[%s2991_s23 + $0x68] sm:$0xff] }
 0x1b4   : > { %v807_v24 = vadd.f32 %v2940_v43, %v806_v21  ;;  %v808_v25 = vpop.f32.mrb[31].mxu0  ;;  %v824_v26 = vmax.f32 %v804_v19, 0.0  ;;  %v2646_v43 = vmov 45   ;;  %v1253_v19 = vld [vmem:[%s2991_s23 + $0x58] sm:$0xff]  ;;  %v1254_v21 = vld [vmem:[%s2991_s23 + $0x60] sm:$0xff] }
 0x1b5   : > { %2398 = vset.pattern.permute.xlu0 %v2646_v43  ;;  %2404 = vset.pattern.permute.xlu1 %v2646_v43  ;;  %v1256_v25 = vld [vmem:[%s2991_s23 + $0x70] sm:$0xff] }
 0x1b6   : > { %v825_v27 = vmax.f32 %v807_v24, 0.0  ;;  %2400 = vperm.xlu0 %2398, %v2399_v34   ;;  %2406 = vperm.xlu1 %2404, %v2405_v29   ;;  %v1257_v24 = vld [vmem:[%s2991_s23 + $0x78] sm:$0xff]  ;;  %s1944_s23 = scalar_lea.sflag [#allocation3], %s363_s24 }
 0x1b8   : > { %v833_v28 = vpack.c.bf16 %v825_v27, %v824_v26  ;;  %v2131_v26 = vld [vmem:[%s3367_s5] ss:$0 sm:$0xff] }
 0x1ba   : > { %2264 = vmatmul.mubr.bf16.gmra.mrb[12].mxu1 %v833_v28  ;;  %1276 = vrot.lane.b32.xlu0 %v1243_v39, %s2648_s27 }
 0x1bb   : > { %1274 = vrot.lane.b32.xlu1 %v1242_v32, %s2648_s27 }
 0x1be   : > { %1278 = vrot.lane.b32.xlu0 %v1244_v41, %s2648_s27 }
 0x1bf   : > { %2411 = vperm.xlu1 %2404, %v2410_v42  }
 0x1c2   : > { %2416 = vperm.xlu0 %2398, %v2415_v50  }
 0x1c3   : > { %1280 = vrot.lane.b32.xlu1 %v1245_v51, %s2648_s27 }
 0x1c6   : > { %1284 = vrot.lane.b32.xlu0 %v1247_v52, %s2648_s27 }
 0x1c7   : > { %1282 = vrot.lane.b32.xlu1 %v1246_v53, %s2648_s27 }
 0x1ca   : > { %1286 = vrot.lane.b32.xlu0 %v1248_v58, %s2648_s27 }
 0x1cb   : > { %2421 = vperm.xlu1 %2404, %v2420_v59  }
 0x1ce   : > { %2426 = vperm.xlu0 %2398, %v2425_v62  }
 0x1cf   : > { %1288 = vrot.lane.b32.xlu1 %v1249_v63, %s2648_s27 }
 0x1d2   : > { %1292 = vrot.lane.b32.xlu0 %v1251_v0, %s2648_s27 }
 0x1d3   : > { %1290 = vrot.lane.b32.xlu1 %v1250_v1, %s2648_s27 }
 0x1d6   : > { %1294 = vrot.lane.b32.xlu0 %v1252_v6, %s2648_s27 }
 0x1d7   : > { %2431 = vperm.xlu1 %2404, %v2430_v14  }
 0x1da   : > { %2436 = vperm.xlu0 %2398, %v2435_v2  }
 0x1db   : > { %1296 = vrot.lane.b32.xlu1 %v1253_v19, %s2648_s27 }
 0x1de   : > { %1300 = vrot.lane.b32.xlu0 %v1255_v20, %s2648_s27 }
 0x1df   : > { %1298 = vrot.lane.b32.xlu1 %v1254_v21, %s2648_s27 }
 0x1e2   : > { %1304 = vrot.lane.b32.xlu0 %v1257_v24, %s2648_s27 }
 0x1e3   : > { %1302 = vrot.lane.b32.xlu1 %v1256_v25, %s2648_s27  ;;  %s2563_s27 = scalar_lea.vmem %s3310_s18, 32 }
 0x1e4   : > { %p2564_p13 = scmp.ne.s32.totalorder %s3310_s18, %s2563_s27 }
 0x1e6   : > { %p2565_p0 = pnand %p2564_p13, %p2742_p4 }
 0x1e8   : > { %p2566_p1 = pneg %p2565_p0 }
 0x25d   : > { %v2253_v27 = vpop.f32.mrb[0].mxu1 }
 0x25e   : > { %v948_v28 = vadd.f32 %v2253_v27, %v2131_v26  ;;  %v939_v30 = vpop.f32.mrb[1].mxu1 }
 0x25f   : > { %v940_v31 = vadd.f32 %v2131_v26, %v939_v30  ;;  %v2254_v43 = vpop.f32.mrb[2].mxu1 }
 0x260   : > { %v951_v33 = vadd.f32 %v2254_v43, %v2131_v26  ;;  %v942_v7 = vpop.f32.mrb[3].mxu1  ;;  %v1004_v18 = vmax.f32 %v948_v28, 0.0 }
 0x261   : > { %v943_v34 = vadd.f32 %v2131_v26, %v942_v7  ;;  %v1002_v29 = vmax.f32 %v940_v31, 0.0 }
 0x262   : > { %v1005_v35 = vmax.f32 %v951_v33, 0.0 }
 0x263   : > { %v1003_v39 = vmax.f32 %v943_v34, 0.0 }
 0x264   : > { %v1019_v32 = vpack.c.bf16 %v1005_v35, %v1004_v18 }
 0x265   : > { %v1018_v38 = vpack.c.bf16 %v1003_v39, %v1002_v29  ;;  %v2407_v39 = vpop.permute.xlu1 %2406 }
 0x267   : > { %2283 = vmatprep.mubr.bf16.mxu1 %v1018_v38 }
 0x268   : > { %2284 = vmatmul.mubr.bf16.vlgmr.msra.gmra.mrb[16].mxu1 %v1019_v32  ;;  %v2401_v32 = vpop.permute.xlu0 %2400 }
 0x269   : > { %v1275_v38 = vpop.permute.xlu1 %1274 }
 0x26d   : > { %v2257_v40 = vpop.f32.mrb[4].mxu1 }
 0x26e   : > { %v964_v41 = vadd.f32 %v2257_v40, %v2131_v26  ;;  %v955_v42 = vpop.f32.mrb[5].mxu1  ;;  %v1277_v40 = vpop.permute.xlu0 %1276 }
 0x26f   : > { %v956_v48 = vadd.f32 %v2131_v26, %v955_v42  ;;  %v2258_v49 = vpop.f32.mrb[6].mxu1 }
 0x270   : > { %v967_v50 = vadd.f32 %v2258_v49, %v2131_v26  ;;  %v958_v51 = vpop.f32.mrb[7].mxu1  ;;  %v1008_v53 = vmax.f32 %v964_v41, 0.0  ;;  %v2412_v41 = vpop.permute.xlu1 %2411 }
 0x271   : > { %v959_v52 = vadd.f32 %v2131_v26, %v958_v51  ;;  %v1006_v57 = vmax.f32 %v956_v48, 0.0  ;;  %v3055_v48 = vld [vmem:[%s3369_s7] ss:$0 sm:$0xff] }
 0x272   : > { %v1009_v56 = vmax.f32 %v967_v50, 0.0  ;;  %v1279_v42 = vpop.permute.xlu0 %1278 }
 0x273   : > { %v1007_v58 = vmax.f32 %v959_v52, 0.0  ;;  %v2402_v52 = vunpack.i.l.bf16 %v2401_v32 }
 0x274   : > { %v1021_v59 = vpack.c.bf16 %v1009_v56, %v1008_v53  ;;  %v1281_v49 = vpop.permute.xlu1 %1280 }
 0x275   : > { %v1020_v60 = vpack.c.bf16 %v1007_v58, %v1006_v57  ;;  %v2403_v57 = vunpack.i.h.bf16 %v2401_v32 }
 0x277   : > { %2287 = vmatprep.mubr.bf16.mxu1 %v1020_v60  ;;  %v2408_v60 = vunpack.i.l.bf16 %v2407_v39 }
 0x278   : > { %2288 = vmatmul.mubr.bf16.gmra.mrb[20].mxu1 %v1021_v59 }
 0x27d   : > { %v2261_v61 = vpop.f32.mrb[8].mxu1 }
 0x27e   : > { %v980_v62 = vadd.f32 %v2261_v61, %v2131_v26  ;;  %v971_v63 = vpop.f32.mrb[9].mxu1  ;;  %v2417_v61 = vpop.permute.xlu0 %2416 }
 0x27f   : > { %v972_v0 = vadd.f32 %v2131_v26, %v971_v63  ;;  %v2262_v1 = vpop.f32.mrb[10].mxu1 }
 0x280   : > { %v983_v3 = vadd.f32 %v2262_v1, %v2131_v26  ;;  %v974_v4 = vpop.f32.mrb[11].mxu1  ;;  %v1012_v14 = vmax.f32 %v980_v62, 0.0  ;;  %v2409_v1 = vunpack.i.h.bf16 %v2407_v39 }
 0x281   : > { %v975_v6 = vadd.f32 %v2131_v26, %v974_v4  ;;  %v1010_v16 = vmax.f32 %v972_v0, 0.0 }
 0x282   : > { %v1013_v15 = vmax.f32 %v983_v3, 0.0 }
 0x283   : > { %v1011_v2 = vmax.f32 %v975_v6, 0.0 }
 0x284   : > { %v1023_v19 = vpack.c.bf16 %v1013_v15, %v1012_v14  ;;  %v1283_v14 = vpop.permute.xlu1 %1282 }
 0x285   : > { %v1022_v20 = vpack.c.bf16 %v1011_v2, %v1010_v16 }
 0x287   : > { %2291 = vmatprep.mubr.bf16.mxu1 %v1022_v20 }
 0x288   : > { %2292 = vmatmul.mubr.bf16.gmra.mrb[24].mxu1 %v1023_v19  ;;  %v1285_v19 = vpop.permute.xlu0 %1284 }
 0x28d   : > { %v2265_v21 = vpop.f32.mrb[12].mxu1 }
 0x28e   : > { %v996_v24 = vadd.f32 %v2265_v21, %v2131_v26  ;;  %v987_v25 = vpop.f32.mrb[13].mxu1 }
 0x28f   : > { %v988_v27 = vadd.f32 %v2131_v26, %v987_v25  ;;  %v2266_v28 = vpop.f32.mrb[14].mxu1  ;;  %v2422_v25 = vpop.permute.xlu1 %2421 }
 0x290   : > { %v999_v30 = vadd.f32 %v2266_v28, %v2131_v26  ;;  %v990_v31 = vpop.f32.mrb[15].mxu1  ;;  %v1016_v33 = vmax.f32 %v996_v24, 0.0  ;;  %v1287_v28 = vpop.permute.xlu0 %1286 }
 0x291   : > { %v991_v43 = vadd.f32 %v2131_v26, %v990_v31  ;;  %v1014_v34 = vmax.f32 %v988_v27, 0.0 }
 0x292   : > { %v1017_v7 = vmax.f32 %v999_v30, 0.0 }
 0x293   : > { %v1015_v18 = vmax.f32 %v991_v43, 0.0 }
 0x294   : > { %v1025_v35 = vpack.c.bf16 %v1017_v7, %v1016_v33 }
 0x295   : > { %v1024_v29 = vpack.c.bf16 %v1015_v18, %v1014_v34  ;;  %v1289_v34 = vpop.permute.xlu1 %1288 }
 0x297   : > { %2295 = vmatprep.mubr.bf16.mxu1 %v1024_v29  ;;  %v2413_v29 = vunpack.i.l.bf16 %v2412_v41 }
 0x298   : > { %2296 = vmatmul.mubr.bf16.gmra.mrb[28].mxu1 %v1025_v35 }
 0x33b   : > { %v2285_v26 = vpop.f32.mrb[16].mxu1 }
 0x33c   : > { %v3058_v50 = vadd.f32 %v2285_v26, %v3055_v48  ;;  %v1131_v51 = vpop.f32.mrb[17].mxu1  ;;  %v2427_v26 = vpop.permute.xlu0 %2426 }
 0x33d   : > { %v3061_v53 = vadd.f32 %v3055_v48, %v1131_v51  ;;  %v2286_v56 = vpop.f32.mrb[18].mxu1 }
 0x33e   : > { %v3064_v58 = vadd.f32 %v2286_v56, %v3055_v48  ;;  %v1134_v59 = vpop.f32.mrb[19].mxu1  ;;  %v1324_v62 = vsub.f32 %v3058_v50, %v1279_v42  ;;  %v2418_v42 = vunpack.i.l.bf16 %v2417_v61  ;;  %v2419_v56 = vunpack.i.h.bf16 %v2417_v61 }
 0x33f   : > { %v1322_v63 = vsub.f32 %v3061_v53, %v1275_v38  ;;  %v3069_v0 = vadd.f32 %v3055_v48, %v1134_v59 }
 0x340   : > { %v1325_v3 = vsub.f32 %v3064_v58, %v1281_v49  ;;  %v1420_v2 = vmul.f32 %v2408_v60, %v1324_v62  ;;  %v1291_v62 = vpop.permute.xlu1 %1290 }
 0x341   : > { %v1323_v4 = vsub.f32 %v3069_v0, %v1277_v40  ;;  %v1418_v6 = vmul.f32 %v2402_v52, %v1322_v63  ;;  %v2414_v40 = vunpack.i.h.bf16 %v2412_v41 }
 0x342   : > { %v1421_v21 = vmul.f32 %v2409_v1, %v1325_v3  ;;  %v1437_v24 = vmul.f32 %v1420_v2, %v1420_v2  ;;  %v1293_v3 = vpop.permute.xlu0 %1292 }
 0x343   : > { %v1435_v15 = vmul.f32 %v1418_v6, %v1418_v6  ;;  %v1419_v16 = vmul.f32 %v2403_v57, %v1323_v4 }
 0x344   : > { %v1438_v27 = vmul.f32 %v1421_v21, %v1421_v21  ;;  %v2432_v6 = vpop.permute.xlu1 %2431 }
 0x345   : > { %1467 = vrot.lane.b32.xlu1 %v1435_v15, %s2649_s20  ;;  %v1436_v20 = vmul.f32 %v1419_v16, %v1419_v16 }
 0x346   : > { %v1295_v16 = vpop.permute.xlu0 %1294 }
 0x347   : > { %1469 = vrot.lane.b32.xlu0 %v1436_v20, %s2649_s20 }
 0x349   : > { %1471 = vrot.lane.b32.xlu1 %v1437_v24, %s2649_s20  ;;  %v1297_v24 = vpop.permute.xlu1 %1296 }
 0x34b   : > { %v2289_v30 = vpop.f32.mrb[20].mxu1  ;;  %1473 = vrot.lane.b32.xlu0 %v1438_v27, %s2649_s20  ;;  %v2423_v27 = vunpack.i.l.bf16 %v2422_v25 }
 0x34c   : > { %v3078_v31 = vadd.f32 %v2289_v30, %v3055_v48  ;;  %v1147_v43 = vpop.f32.mrb[21].mxu1 }
 0x34d   : > { %v3081_v33 = vadd.f32 %v3055_v48, %v1147_v43  ;;  %v2290_v7 = vpop.f32.mrb[22].mxu1 }
 0x34e   : > { %v3084_v18 = vadd.f32 %v2290_v7, %v3055_v48  ;;  %v1150_v35 = vpop.f32.mrb[23].mxu1  ;;  %v1328_v39 = vsub.f32 %v3078_v31, %v1287_v28  ;;  %v2424_v7 = vunpack.i.h.bf16 %v2422_v25 }
 0x34f   : > { %v1326_v32 = vsub.f32 %v3081_v33, %v1283_v14  ;;  %v3089_v38 = vadd.f32 %v3055_v48, %v1150_v35 }
 0x350   : > { %v1329_v49 = vsub.f32 %v3084_v18, %v1289_v34  ;;  %v1424_v60 = vmul.f32 %v2418_v42, %v1328_v39  ;;  %v2428_v34 = vunpack.i.l.bf16 %v2427_v26 }
 0x351   : > { %v1327_v51 = vsub.f32 %v3089_v38, %v1285_v19  ;;  %v1422_v52 = vmul.f32 %v2413_v29, %v1326_v32  ;;  %v2429_v32 = vunpack.i.h.bf16 %v2427_v26 }
 0x352   : > { %v1425_v1 = vmul.f32 %v2419_v56, %v1329_v49  ;;  %v1441_v41 = vmul.f32 %v1424_v60, %v1424_v60 }
 0x353   : > { %v1439_v57 = vmul.f32 %v1422_v52, %v1422_v52  ;;  %v1423_v59 = vmul.f32 %v2414_v40, %v1327_v51  ;;  %v2437_v51 = vpop.permute.xlu0 %2436 }
 0x354   : > { %v1442_v4 = vmul.f32 %v1425_v1, %v1425_v1 }
 0x355   : > { %1475 = vrot.lane.b32.xlu1 %v1439_v57, %s2649_s20  ;;  %v1440_v63 = vmul.f32 %v1423_v59, %v1423_v59  ;;  %v1299_v57 = vpop.permute.xlu1 %1298 }
 0x357   : > { %1477 = vrot.lane.b32.xlu0 %v1440_v63, %s2649_s20  ;;  %v1301_v25 = vpop.permute.xlu0 %1300 }
 0x359   : > { %1479 = vrot.lane.b32.xlu1 %v1441_v41, %s2649_s20  ;;  %v1303_v1 = vpop.permute.xlu1 %1302 }
 0x35b   : > { %v2293_v14 = vpop.f32.mrb[24].mxu1  ;;  %1481 = vrot.lane.b32.xlu0 %v1442_v4, %s2649_s20 }
 0x35c   : > { %v3098_v61 = vadd.f32 %v2293_v14, %v3055_v48  ;;  %v1163_v15 = vpop.f32.mrb[25].mxu1 }
 0x35d   : > { %v3101_v2 = vadd.f32 %v3055_v48, %v1163_v15  ;;  %v2294_v19 = vpop.f32.mrb[26].mxu1  ;;  %v1305_v15 = vpop.permute.xlu0 %1304 }
 0x35e   : > { %v3104_v20 = vadd.f32 %v2294_v19, %v3055_v48  ;;  %v1166_v21 = vpop.f32.mrb[27].mxu1  ;;  %v1332_v28 = vsub.f32 %v3098_v61, %v1295_v16  ;;  %v2433_v16 = vunpack.i.l.bf16 %v2432_v6 }
 0x35f   : > { %v1330_v30 = vsub.f32 %v3101_v2, %v1291_v62  ;;  %v3109_v43 = vadd.f32 %v3055_v48, %v1166_v21 }
 0x360   : > { %v1333_v29 = vsub.f32 %v3104_v20, %v1297_v24  ;;  %v1428_v49 = vmul.f32 %v2428_v34, %v1332_v28  ;;  %v2438_v28 = vunpack.i.l.bf16 %v2437_v51 }
 0x361   : > { %v1331_v35 = vsub.f32 %v3109_v43, %v1293_v3  ;;  %v1426_v39 = vmul.f32 %v2423_v27, %v1330_v30  ;;  %v2434_v27 = vunpack.i.h.bf16 %v2432_v6  ;;  %v2165_v6 = vsel %vm1560_vm0, 1.0, %v2647_v5 }
 0x362   : > { %v1429_v52 = vmul.f32 %v2429_v32, %v1333_v29  ;;  %v1445_v59 = vmul.f32 %v1428_v49, %v1428_v49  ;;  %vm1568_vm0 = vcmp.eq.f32.partialorder %v2839_v37, 0.0 }
 0x363   : > { %v1443_v40 = vmul.f32 %v1426_v39, %v1426_v39  ;;  %v1427_v42 = vmul.f32 %v2424_v7, %v1331_v35  ;;  %v2439_v35 = vunpack.i.h.bf16 %v2437_v51  ;;  %v2182_v51 = vsel %vm1749_vm11, 1.0, %v2647_v5 }
 0x364   : > { %v1446_v60 = vmul.f32 %v1429_v52, %v1429_v52  ;;  %v2183_v52 = vsel %vm1750_vm12, 1.0, %v2647_v5  ;;  %vm1569_vm11 = vcmp.eq.f32.partialorder %v2836_v36, 0.0  ;;  %vm1758_vm12 = vcmp.eq.f32.partialorder %v2836_v36, 1.0 }
 0x365   : > { %1483 = vrot.lane.b32.xlu1 %v1443_v40, %s2649_s20  ;;  %v1444_v56 = vmul.f32 %v1427_v42, %v1427_v42  ;;  %v2166_v42 = vsel %vm1561_vm10, 1.0, %v2647_v5  ;;  %vm1757_vm10 = vcmp.eq.f32.partialorder %v2839_v37, 1.0  ;;  %v2173_v22 = vsel %vm1568_vm0, 1.0, %v2647_v5 }
 0x366   : > { %v2440_v9 = vpack.i.bf16 %v2166_v42, %v2165_v6  ;;  %v2174_v37 = vsel %vm1569_vm11, 1.0, %v2647_v5  ;;  %v2175_v36 = vsel %vm1570_vm13, 1.0, %v2647_v5  ;;  %vm1515_vm0 = vcmask 23552  }
 0x367   : > { %1485 = vrot.lane.b32.xlu0 %v1444_v56, %s2649_s20  ;;  %vm395_vm11 = vcmask 66560  }
 0x368   : > { %396 = vst.msk [vmem:[%s3284_s25] sm:$0x3] %vm395_vm11, %v2647_v5 }
 0x369   : > { %1487 = vrot.lane.b32.xlu1 %v1445_v59, %s2649_s20  ;;  %v2445_v59 = vpack.i.bf16 %v2183_v52, %v2182_v51 }
 0x36b   : > { %v2297_v62 = vpop.f32.mrb[28].mxu1  ;;  %1489 = vrot.lane.b32.xlu0 %v1446_v60, %s2649_s20 }
 0x36c   : > { %v3118_v26 = vadd.f32 %v2297_v62, %v3055_v48  ;;  %v1179_v63 = vpop.f32.mrb[29].mxu1  ;;  %v2186_v62 = vsel %vm1753_vm3, 1.0, %v2647_v5  ;;  %vm1761_vm3 = vcmp.eq.f32.partialorder %v2862_v47, 1.0  ;;  %v2178_v47 = vsel %vm1573_vm4, 1.0, %v2647_v5 }
 0x36d   : > { %v3121_v3 = vadd.f32 %v3055_v48, %v1179_v63  ;;  %v2298_v41 = vpop.f32.mrb[30].mxu1 }
 0x36e   : > { %v3124_v4 = vadd.f32 %v2298_v41, %v3055_v48  ;;  %v1182_v14 = vpop.f32.mrb[31].mxu1  ;;  %v1336_v21 = vsub.f32 %v3118_v26, %v1303_v1  ;;  %v2187_v1 = vsel %vm1754_vm5, 1.0, %v2647_v5  ;;  %v2460_v41 = vpack.i.bf16 %v2186_v62, %v2169_v10 }
 0x36f   : > { %v1334_v19 = vsub.f32 %v3121_v3, %v1299_v57  ;;  %v3129_v24 = vadd.f32 %v3055_v48, %v1182_v14  ;;  %v2184_v57 = vsel %vm1751_vm14, 1.0, %v2647_v5  ;;  %v2188_v14 = vsel %vm1755_vm7, 1.0, %v2647_v5 }
 0x370   : > { %v1337_v7 = vsub.f32 %v3124_v4, %v1305_v15  ;;  %v1432_v29 = vmul.f32 %v2438_v28, %v1336_v21  ;;  %v2450_v60 = vpack.i.bf16 %v2184_v57, %v2167_v11  ;;  %v2465_v15 = vpack.i.bf16 %v2187_v1, %v2170_v13 }
 0x371   : > { %v1335_v30 = vsub.f32 %v3129_v24, %v1301_v25  ;;  %v1430_v34 = vmul.f32 %v2433_v16, %v1334_v19  ;;  %v2185_v25 = vsel %vm1752_vm1, 1.0, %v2647_v5  ;;  %v2189_v16 = vsel %vm1756_vm9, 1.0, %v2647_v5 }
 0x372   : > { %v1433_v40 = vmul.f32 %v2439_v35, %v1337_v7  ;;  %v1449_v49 = vmul.f32 %v1432_v29, %v1432_v29  ;;  %v2455_v63 = vpack.i.bf16 %v2185_v25, %v2168_v8  ;;  %v2470_v19 = vpack.i.bf16 %v2188_v14, %v2171_v12 }
 0x373   : > { %v1447_v39 = vmul.f32 %v1430_v34, %v1430_v34  ;;  %v1431_v32 = vmul.f32 %v2434_v27, %v1335_v30  ;;  %v2190_v21 = vsel %vm1757_vm10, 1.0, %v2647_v5  ;;  %v2475_v27 = vpack.i.bf16 %v2189_v16, %v2172_v23 }
 0x374   : > { %v1450_v56 = vmul.f32 %v1433_v40, %v1433_v40  ;;  %vm1759_vm14 = vcmp.eq.f32.partialorder %v2854_v45, 1.0  ;;  %v2191_v28 = vsel %vm1758_vm12, 1.0, %v2647_v5  ;;  %v2480_v30 = vpack.i.bf16 %v2190_v21, %v2173_v22 }
 0x375   : > { %1491 = vrot.lane.b32.xlu1 %v1447_v39, %s2649_s20  ;;  %v1448_v48 = vmul.f32 %v1431_v32, %v1431_v32  ;;  %vm1760_vm1 = vcmp.eq.f32.partialorder %v2851_v44, 1.0  ;;  %v2192_v7 = vsel %vm1759_vm14, 1.0, %v2647_v5  ;;  %v2485_v34 = vpack.i.bf16 %v2191_v28, %v2174_v37 }
 0x376   : > { %v2176_v45 = vsel %vm1571_vm15, 1.0, %v2647_v5  ;;  %v2193_v35 = vsel %vm1760_vm1, 1.0, %v2647_v5  ;;  %v2490_v29 = vpack.i.bf16 %v2192_v7, %v2175_v36  ;;  %vm1762_vm5 = vcmp.eq.f32.partialorder %v2859_v46, 1.0 }
 0x377   : > { %1493 = vrot.lane.b32.xlu0 %v1448_v48, %s2649_s20  ;;  %v2177_v44 = vsel %vm1572_vm2, 1.0, %v2647_v5  ;;  %v2194_v39 = vsel %vm1761_vm3, 1.0, %v2647_v5  ;;  %v2495_v32 = vpack.i.bf16 %v2193_v35, %v2176_v45  ;;  %vm1763_vm7 = vcmp.eq.f32.partialorder %v2877_v55, 1.0 }
 0x378   : > { %v2195_v40 = vsel %vm1762_vm5, 1.0, %v2647_v5  ;;  %v2500_v48 = vpack.i.bf16 %v2194_v39, %v2177_v44  ;;  %vm1764_vm9 = vcmp.eq.f32.partialorder %v2874_v54, 1.0  ;;  %v2179_v46 = vsel %vm1574_vm6, 1.0, %v2647_v5 }
 0x379   : > { %1495 = vrot.lane.b32.xlu1 %v1449_v49, %s2649_s20  ;;  %v2196_v6 = vsel %vm1763_vm7, 1.0, %v2647_v5  ;;  %v2505_v42 = vpack.i.bf16 %v2195_v40, %v2178_v47  ;;  %v2180_v49 = vsel %vm1575_vm8, 1.0, %v2647_v5  ;;  %v2197_v55 = vsel %vm1764_vm9, 1.0, %v2647_v5 }
 0x37a   : > { %v2510_v51 = vpack.i.bf16 %v2196_v6, %v2179_v46  ;;  %v2515_v52 = vpack.i.bf16 %v2197_v55, %v2180_v49  ;;  %vm1704_vm10 = vcmask 917304   ;;  %vm397_vm14 = vcmask 0  }
 0x37b   : > { %1497 = vrot.lane.b32.xlu0 %v1450_v56, %s2649_s20  ;;  %398 = vst.msk [vmem:[%s3297_s28] sm:$0x1] %vm397_vm14, %v2647_v5 }
 0x37d   : > { %2441 = vperm.xlu1 %2404, %v2440_v9  }
 0x37f   : > { %2446 = vperm.xlu0 %2398, %v2445_v59  }
 0x381   : > { %2451 = vperm.xlu1 %2404, %v2450_v60  }
 0x383   : > { %2456 = vperm.xlu0 %2398, %v2455_v63  }
 0x385   : > { %2461 = vperm.xlu1 %2404, %v2460_v41  }
 0x387   : > { %2466 = vperm.xlu0 %2398, %v2465_v15  }
 0x389   : > { %2471 = vperm.xlu1 %2404, %v2470_v19  }
 0x38b   : > { %2476 = vperm.xlu0 %2398, %v2475_v27  }
 0x38d   : > { %2481 = vperm.xlu1 %2404, %v2480_v30  }
 0x38f   : > { %2486 = vperm.xlu0 %2398, %v2485_v34  }
 0x391   : > { %2491 = vperm.xlu1 %2404, %v2490_v29  }
 0x393   : > { %2496 = vperm.xlu0 %2398, %v2495_v32  }
 0x395   : > { %2501 = vperm.xlu1 %2404, %v2500_v48  }
 0x397   : > { %2506 = vperm.xlu0 %2398, %v2505_v42  }
 0x399   : > { %2511 = vperm.xlu1 %2404, %v2510_v51  }
 0x39b   : > { %2516 = vperm.xlu0 %2398, %v2515_v52  }
 0x3b7   : > { %v1468_v56 = vpop.permute.xlu1 %1467 }
 0x3b8   : > { %v1516_v57 = vsel %vm1515_vm0, %v1468_v56, 0.0 }
 0x3b9   : > { %v1470_v9 = vpop.permute.xlu0 %1469 }
 0x3ba   : > { %v1517_v54 = vsel %vm1515_vm0, %v1470_v9, 0.0 }
 0x3bb   : > { %v1472_v11 = vpop.permute.xlu1 %1471  ;;  %v1518_v59 = vadd.f32 %v1517_v54, %v1516_v57 }
 0x3bc   : > { %v1519_v8 = vsel %vm1515_vm0, %v1472_v11, 0.0 }
 0x3bd   : > { %v1474_v25 = vpop.permute.xlu0 %1473  ;;  %v1520_v60 = vadd.f32 %v1519_v8, %v1518_v59 }
 0x3be   : > { %v1521_v62 = vsel %vm1515_vm0, %v1474_v25, 0.0 }
 0x3bf   : > { %v1522_v13 = vadd.f32 %v1521_v62, %v1520_v60 }
 0x3c7   : > { %v1476_v10 = vpop.permute.xlu1 %1475 }
 0x3c8   : > { %v1523_v63 = vsel %vm1515_vm0, %v1476_v10, 0.0 }
 0x3c9   : > { %v1478_v1 = vpop.permute.xlu0 %1477  ;;  %v1524_v41 = vadd.f32 %v1523_v63, %v1522_v13 }
 0x3ca   : > { %v1525_v12 = vsel %vm1515_vm0, %v1478_v1, 0.0 }
 0x3cb   : > { %v1480_v14 = vpop.permute.xlu1 %1479  ;;  %v1526_v15 = vadd.f32 %v1525_v12, %v1524_v41 }
 0x3cc   : > { %v1527_v23 = vsel %vm1515_vm0, %v1480_v14, 0.0 }
 0x3cd   : > { %v1482_v16 = vpop.permute.xlu0 %1481  ;;  %v1528_v19 = vadd.f32 %v1527_v23, %v1526_v15 }
 0x3ce   : > { %v1529_v22 = vsel %vm1515_vm0, %v1482_v16, 0.0 }
 0x3cf   : > { %v1530_v37 = vadd.f32 %v1529_v22, %v1528_v19 }
 0x3d7   : > { %v1484_v21 = vpop.permute.xlu1 %1483 }
 0x3d8   : > { %v1531_v27 = vsel %vm1515_vm0, %v1484_v21, 0.0 }
 0x3d9   : > { %v1486_v28 = vpop.permute.xlu0 %1485  ;;  %v1532_v30 = vadd.f32 %v1531_v27, %v1530_v37 }
 0x3da   : > { %v1533_v36 = vsel %vm1515_vm0, %v1486_v28, 0.0 }
 0x3db   : > { %v1488_v7 = vpop.permute.xlu1 %1487  ;;  %v1534_v34 = vadd.f32 %v1533_v36, %v1532_v30 }
 0x3dc   : > { %v1535_v45 = vsel %vm1515_vm0, %v1488_v7, 0.0 }
 0x3dd   : > { %v1490_v35 = vpop.permute.xlu0 %1489  ;;  %v1536_v29 = vadd.f32 %v1535_v45, %v1534_v34 }
 0x3de   : > { %v1537_v44 = vsel %vm1515_vm0, %v1490_v35, 0.0 }
 0x3df   : > { %v1538_v39 = vadd.f32 %v1537_v44, %v1536_v29 }
 0x3e7   : > { %v1492_v32 = vpop.permute.xlu1 %1491 }
 0x3e8   : > { %v1539_v47 = vsel %vm1515_vm0, %v1492_v32, 0.0 }
 0x3e9   : > { %v1540_v40 = vadd.f32 %v1539_v47, %v1538_v39  ;;  %v1494_v48 = vpop.permute.xlu0 %1493 }
 0x3ea   : > { %v1541_v46 = vsel %vm1515_vm0, %v1494_v48, 0.0 }
 0x3eb   : > { %v1542_v6 = vadd.f32 %v1541_v46, %v1540_v40  ;;  %v1496_v42 = vpop.permute.xlu1 %1495 }
 0x3ec   : > { %v1543_v49 = vsel %vm1515_vm0, %v1496_v42, 0.0 }
 0x3ed   : > { %v1544_v55 = vadd.f32 %v1543_v49, %v1542_v6  ;;  %v1498_v51 = vpop.permute.xlu0 %1497 }
 0x3ee   : > { %v1545_v52 = vsel %vm1515_vm0, %v1498_v51, 0.0 }
 0x3ef   : > { %v1546_v56 = vadd.f32 %v1545_v52, %v1544_v55 }
 0x3f1   : > { %1547 = vadd.xlane.f32.xlu1 %v1546_v56 }
 0x3fc   : > { %v2442_v9 = vpop.permute.xlu1 %2441 }
 0x3fd   : > { %v2444_v54 = vunpack.i.h.bf16 %v2442_v9  ;;  %v2443_v11 = vunpack.i.l.bf16 %v2442_v9 }
 0x3fe   : > { %v2447_v57 = vpop.permute.xlu0 %2446 }
 0x3ff   : > { %v1689_v59 = vmul.f32 %v2444_v54, %v3069_v0  ;;  %v1688_v8 = vmul.f32 %v2443_v11, %v3061_v53  ;;  %v2449_v25 = vunpack.i.h.bf16 %v2447_v57  ;;  %v2448_v60 = vunpack.i.l.bf16 %v2447_v57 }
 0x400   : > { %v2452_v10 = vpop.permute.xlu1 %2451 }
 0x401   : > { %v1706_v62 = vsel %vm1704_vm10, %v1689_v59, 0.0  ;;  %v1705_v63 = vsel %vm1704_vm10, %v1688_v8, 0.0  ;;  %v1878_v13 = vmul.f32 %v2449_v25, %v3069_v0  ;;  %v1877_v1 = vmul.f32 %v2448_v60, %v3061_v53 }
 0x402   : > { %v2454_v41 = vunpack.i.h.bf16 %v2452_v10  ;;  %v2453_v12 = vunpack.i.l.bf16 %v2452_v10  ;;  %v2457_v14 = vpop.permute.xlu0 %2456  ;;  %v1707_v22 = vadd.f32 %v1706_v62, %v1705_v63 }
 0x403   : > { %v1894_v15 = vsel %vm1704_vm10, %v1878_v13, 0.0  ;;  %v1893_v23 = vsel %vm1704_vm10, %v1877_v1, 0.0  ;;  %v2459_v16 = vunpack.i.h.bf16 %v2457_v14  ;;  %v2458_v19 = vunpack.i.l.bf16 %v2457_v14 }
 0x404   : > { %v1895_v21 = vadd.f32 %v1894_v15, %v1893_v23  ;;  %v1879_v27 = vmul.f32 %v2454_v41, %v3058_v50  ;;  %v1690_v37 = vmul.f32 %v2453_v12, %v3058_v50  ;;  %v2462_v28 = vpop.permute.xlu1 %2461 }
 0x405   : > { %v1880_v0 = vmul.f32 %v2459_v16, %v3064_v58  ;;  %v1691_v53 = vmul.f32 %v2458_v19, %v3064_v58  ;;  %v2464_v30 = vunpack.i.h.bf16 %v2462_v28  ;;  %v2463_v36 = vunpack.i.l.bf16 %v2462_v28 }
 0x406   : > { %v1896_v7 = vsel %vm1704_vm10, %v1879_v27, 0.0  ;;  %v1708_v34 = vsel %vm1704_vm10, %v1690_v37, 0.0  ;;  %v2467_v45 = vpop.permute.xlu0 %2466 }
 0x407   : > { %v1897_v35 = vadd.f32 %v1896_v7, %v1895_v21  ;;  %v1709_v29 = vadd.f32 %v1708_v34, %v1707_v22  ;;  %v1898_v44 = vsel %vm1704_vm10, %v1880_v0, 0.0  ;;  %v1710_v39 = vsel %vm1704_vm10, %v1691_v53, 0.0 }
 0x408   : > { %v1881_v50 = vmul.f32 %v2464_v30, %v3081_v33  ;;  %v1692_v32 = vmul.f32 %v2463_v36, %v3081_v33  ;;  %v2469_v47 = vunpack.i.h.bf16 %v2467_v45  ;;  %v2468_v40 = vunpack.i.l.bf16 %v2467_v45  ;;  %v2472_v58 = vpop.permute.xlu1 %2471 }
 0x409   : > { %v1711_v48 = vadd.f32 %v1710_v39, %v1709_v29  ;;  %v1899_v46 = vadd.f32 %v1898_v44, %v1897_v35  ;;  %v2474_v6 = vunpack.i.h.bf16 %v2472_v58  ;;  %v2473_v42 = vunpack.i.l.bf16 %v2472_v58 }
 0x40a   : > { %v1900_v49 = vsel %vm1704_vm10, %v1881_v50, 0.0  ;;  %v1712_v55 = vsel %vm1704_vm10, %v1692_v32, 0.0  ;;  %v1882_v51 = vmul.f32 %v2469_v47, %v3089_v38  ;;  %v1693_v52 = vmul.f32 %v2468_v40, %v3089_v38  ;;  %v2477_v56 = vpop.permute.xlu0 %2476 }
 0x40b   : > { %v1713_v9 = vadd.f32 %v1712_v55, %v1711_v48  ;;  %v1901_v54 = vadd.f32 %v1900_v49, %v1899_v46  ;;  %v1883_v33 = vmul.f32 %v2474_v6, %v3078_v31  ;;  %v1694_v11 = vmul.f32 %v2473_v42, %v3078_v31 }
 0x40c   : > { %v1902_v57 = vsel %vm1704_vm10, %v1882_v51, 0.0  ;;  %v1714_v59 = vsel %vm1704_vm10, %v1693_v52, 0.0  ;;  %v2479_v8 = vunpack.i.h.bf16 %v2477_v56  ;;  %v2478_v25 = vunpack.i.l.bf16 %v2477_v56  ;;  %v2482_v60 = vpop.permute.xlu1 %2481 }
 0x40d   : > { %v1715_v10 = vadd.f32 %v1714_v59, %v1713_v9  ;;  %v1903_v62 = vadd.f32 %v1902_v57, %v1901_v54  ;;  %v1904_v63 = vsel %vm1704_vm10, %v1883_v33, 0.0  ;;  %v1716_v38 = vsel %vm1704_vm10, %v1694_v11, 0.0 }
 0x40e   : > { %v1884_v13 = vmul.f32 %v2479_v8, %v3084_v18  ;;  %v1695_v1 = vmul.f32 %v2478_v25, %v3084_v18  ;;  %v2484_v41 = vunpack.i.h.bf16 %v2482_v60  ;;  %v2483_v12 = vunpack.i.l.bf16 %v2482_v60  ;;  %v2487_v31 = vpop.permute.xlu0 %2486 }
 0x40f   : > { %v1717_v14 = vadd.f32 %v1716_v38, %v1715_v10  ;;  %v1905_v15 = vadd.f32 %v1904_v63, %v1903_v62  ;;  %v2489_v23 = vunpack.i.h.bf16 %v2487_v31  ;;  %v2488_v16 = vunpack.i.l.bf16 %v2487_v31 }
 0x410   : > { %v1906_v19 = vsel %vm1704_vm10, %v1884_v13, 0.0  ;;  %v1718_v22 = vsel %vm1704_vm10, %v1695_v1, 0.0  ;;  %v1885_v21 = vmul.f32 %v2484_v41, %v3101_v2  ;;  %v1696_v27 = vmul.f32 %v2483_v12, %v3101_v2  ;;  %v2492_v37 = vpop.permute.xlu1 %2491 }
 0x411   : > { %v1719_v28 = vadd.f32 %v1718_v22, %v1717_v14  ;;  %v1907_v0 = vadd.f32 %v1906_v19, %v1905_v15  ;;  %v1886_v18 = vmul.f32 %v2489_v23, %v3109_v43  ;;  %v1697_v53 = vmul.f32 %v2488_v16, %v3109_v43 }
 0x412   : > { %v1908_v30 = vsel %vm1704_vm10, %v1885_v21, 0.0  ;;  %v1720_v36 = vsel %vm1704_vm10, %v1696_v27, 0.0  ;;  %v2494_v7 = vunpack.i.h.bf16 %v2492_v37  ;;  %v2493_v34 = vunpack.i.l.bf16 %v2492_v37  ;;  %v2497_v45 = vpop.permute.xlu0 %2496 }
 0x413   : > { %v1721_v35 = vadd.f32 %v1720_v36, %v1719_v28  ;;  %v1909_v29 = vadd.f32 %v1908_v30, %v1907_v0  ;;  %v1910_v44 = vsel %vm1704_vm10, %v1886_v18, 0.0  ;;  %v1722_v2 = vsel %vm1704_vm10, %v1697_v53, 0.0 }
 0x414   : > { %v1887_v39 = vmul.f32 %v2494_v7, %v3098_v61  ;;  %v1698_v50 = vmul.f32 %v2493_v34, %v3098_v61  ;;  %v2499_v32 = vunpack.i.h.bf16 %v2497_v45  ;;  %v2498_v47 = vunpack.i.l.bf16 %v2497_v45  ;;  %v2502_v43 = vpop.permute.xlu1 %2501 }
 0x415   : > { %v1723_v40 = vadd.f32 %v1722_v2, %v1721_v35  ;;  %v1911_v58 = vadd.f32 %v1910_v44, %v1909_v29  ;;  %v2504_v48 = vunpack.i.h.bf16 %v2502_v43  ;;  %v2503_v46 = vunpack.i.l.bf16 %v2502_v43 }
 0x416   : > { %v1912_v6 = vsel %vm1704_vm10, %v1887_v39, 0.0  ;;  %v1724_v42 = vsel %vm1704_vm10, %v1698_v50, 0.0  ;;  %v1888_v49 = vmul.f32 %v2499_v32, %v3104_v20  ;;  %v1699_v55 = vmul.f32 %v2498_v47, %v3104_v20  ;;  %v2507_v51 = vpop.permute.xlu0 %2506 }
 0x417   : > { %v1725_v52 = vadd.f32 %v1724_v42, %v1723_v40  ;;  %v1913_v56 = vadd.f32 %v1912_v6, %v1911_v58  ;;  %v1889_v61 = vmul.f32 %v2504_v48, %v3121_v3  ;;  %v1700_v9 = vmul.f32 %v2503_v46, %v3121_v3 }
 0x418   : > { %v1914_v54 = vsel %vm1704_vm10, %v1888_v49, 0.0  ;;  %v1726_v33 = vsel %vm1704_vm10, %v1699_v55, 0.0  ;;  %v2509_v11 = vunpack.i.h.bf16 %v2507_v51  ;;  %v2508_v57 = vunpack.i.l.bf16 %v2507_v51  ;;  %v2512_v59 = vpop.permute.xlu1 %2511 }
 0x419   : > { %v1727_v8 = vadd.f32 %v1726_v33, %v1725_v52  ;;  %v1915_v25 = vadd.f32 %v1914_v54, %v1913_v56  ;;  %v1916_v60 = vsel %vm1704_vm10, %v1889_v61, 0.0  ;;  %v1728_v20 = vsel %vm1704_vm10, %v1700_v9, 0.0  ;;  %v1935_v52 = vld [vmem:[%s3284_s25] sm:$0x3] }
 0x41a   : > { %v1890_v10 = vmul.f32 %v2509_v11, %v3129_v24  ;;  %v1701_v62 = vmul.f32 %v2508_v57, %v3129_v24  ;;  %v2514_v3 = vunpack.i.h.bf16 %v2512_v59  ;;  %v2513_v63 = vunpack.i.l.bf16 %v2512_v59  ;;  %v2517_v38 = vpop.permute.xlu0 %2516 }
 0x41b   : > { %v1729_v13 = vadd.f32 %v1728_v20, %v1727_v8  ;;  %v1917_v1 = vadd.f32 %v1916_v60, %v1915_v25  ;;  %v2519_v41 = vunpack.i.h.bf16 %v2517_v38  ;;  %v2518_v12 = vunpack.i.l.bf16 %v2517_v38 }
 0x41c   : > { %v1918_v31 = vsel %vm1704_vm10, %v1890_v10, 0.0  ;;  %v1730_v14 = vsel %vm1704_vm10, %v1701_v62, 0.0  ;;  %v1891_v15 = vmul.f32 %v2514_v3, %v3118_v26  ;;  %v1702_v23 = vmul.f32 %v2513_v63, %v3118_v26 }
 0x41d   : > { %v1731_v16 = vadd.f32 %v1730_v14, %v1729_v13  ;;  %v1919_v24 = vadd.f32 %v1918_v31, %v1917_v1  ;;  %v1892_v19 = vmul.f32 %v2519_v41, %v3124_v4  ;;  %v1703_v22 = vmul.f32 %v2518_v12, %v3124_v4 }
 0x41e   : > { %v1920_v21 = vsel %vm1704_vm10, %v1891_v15, 0.0  ;;  %v1732_v27 = vsel %vm1704_vm10, %v1702_v23, 0.0  ;;  %v1743_v34 = vshrl.u32 %v447_v17, 7 }
 0x41f   : > { %v1733_v37 = vadd.f32 %v1732_v27, %v1731_v16  ;;  %v1921_v28 = vadd.f32 %v1920_v21, %v1919_v24  ;;  %v1922_v0 = vsel %vm1704_vm10, %v1892_v19, 0.0  ;;  %v1734_v26 = vsel %vm1704_vm10, %v1703_v22, 0.0 }
 0x420   : > { %vm1744_vm12 = vcmp.eq.s32.totalorder %v1743_v34, 0  ;;  %vm1930_vm13 = vcmp.eq.s32.totalorder %v1743_v34, 1 }
 0x421   : > { %v1735_v4 = vadd.f32 %v1734_v26, %v1733_v37  ;;  %v1923_v18 = vadd.f32 %v1922_v0, %v1921_v28  ;;  %v2181_v50 = vsel %vm1744_vm12, 1.0, %v2647_v5  ;;  %v2198_v32 = vsel %vm1930_vm13, 1.0, %v2647_v5 }
 0x423   : > { %v1736_v53 = vrot.slane %v1735_v4, 4  ;;  %v1924_v30 = vrot.slane %v1923_v18, 4 }
 0x425   : > { %v1737_v36 = vadd.f32 %v1736_v53, %v1735_v4  ;;  %v1925_v7 = vadd.f32 %v1924_v30, %v1923_v18 }
 0x427   : > { %v1738_v45 = vrot.slane %v1737_v36, 2  ;;  %v1926_v35 = vrot.slane %v1925_v7, 2 }
 0x429   : > { %v1739_v29 = vadd.f32 %v1738_v45, %v1737_v36  ;;  %v1927_v44 = vadd.f32 %v1926_v35, %v1925_v7 }
 0x42b   : > { %v1740_v2 = vrot.slane %v1739_v29, 1  ;;  %v1928_v39 = vrot.slane %v1927_v44, 1 }
 0x42d   : > { %v1741_v17 = vadd.f32 %v1740_v2, %v1739_v29  ;;  %v1929_v47 = vadd.f32 %v1928_v39, %v1927_v44 }
 0x42f   : > { %v1747_v43 = vmul.f32 %v2181_v50, %v1741_v17  ;;  %v1933_v40 = vmul.f32 %v2198_v32, %v1929_v47 }
 0x431   : > { %v1934_v58 = vadd.f32 %v1933_v40, %v1747_v43 }
 0x433   : > { %1937 = vrot.lane.b32.xlu0 %v1934_v58, %s2650_s29  ;;  %s2567_s29 = sshll.u32 %s2651_s12, 4  ;;  %s2568_s29 = int_to_ptr.vmem [resolvable:$false] %s2567_s29 }
 0x434   : > { %s2569_s20 = scalar_lea.vmem %s2568_s29, 64  ;;  %p2570_p2 = scmp.lt.s32.totalorder %s3310_s18, %s2568_s29 }
 0x435   : > { %p2571_p3 = scmp.lt.s32.totalorder %s2569_s20, %s2563_s27 }
 0x437   : > { %p2572_p5 = por %p2571_p3, %p2570_p2 }
 0x439   : > { %p2573_p6 = pnand %p2572_p5, %p2566_p1 }
 0x47e   : > { %v1548_v48 = vpop.xlane.xlu1 %1547 }
 0x47f   : > { %v1549_v46 = vrot.slane %v1548_v48, 4 }
 0x481   : > { %v1550_v6 = vadd.f32 %v1549_v46, %v1548_v48 }
 0x483   : > { %v1551_v42 = vrot.slane %v1550_v6, 2 }
 0x485   : > { %v1552_v49 = vadd.f32 %v1551_v42, %v1550_v6 }
 0x487   : > { %v1553_v55 = vrot.slane %v1552_v49, 1 }
 0x489   : > { %v1554_v51 = vadd.f32 %v1553_v55, %v1552_v49 }
 0x48b   : > { %2331 = vpush %v1554_v51 }
 0x4a5   : > { %v1938_v5 = vpop.permute.xlu0 %1937 }
 0x4a6   : > { %v1940_v56 = vadd.f32 %v1938_v5, %v1935_v52 }
 0x4a8   : > { %1942 = vst.msk [vmem:[%s3284_s25] sm:$0x3] %vm395_vm11, %v1940_v56 }
 0x4a9   : > { %2576 = shalt.err (!%p2573_p6)
}
 0x4aa   : > { %s2577_s24 = scalar_lea.hbm %s3308_s26, 32  ;;  %s2581_s16 = scalar_lea.hbm %s3370_s8, 64 }
 0x4ab   : > { %p2578_p7 = scmp.ne.s32.totalorder %s3308_s26, %s2577_s24  ;;  %p2582_p11 = scmp.lt.u32.totalorder %s3308_s26, %s3370_s8 }
 0x4ac   : > { %p2583_p12 = scmp.lt.u32.totalorder %s2581_s16, %s2577_s24  ;;  %p2585_p0 = scmp.lt.u32.totalorder %s2577_s24, %s3308_s26 }
 0x4ad   : > { %p2579_p9 = pnand %p2578_p7, %p2742_p4 }
 0x4ae   : > { %p2584_p13 = por %p2583_p12, %p2582_p11 }
 0x4af   : > { %p2580_p10 = pneg %p2579_p9 }
 0x4b0   : > { %p2586_p1 = por %p2585_p0, %p2584_p13 }
 0x4b2   : > { %p2587_p2 = pnand %p2586_p1, %p2580_p10 }
 0x4b4   : > { %2590 = shalt.err (!%p2587_p2)
}
 0x4b5   : > { %2333 = dma.vmem_to_hbm [thread:$0]  (%p2742_p4), %s3310_s18, 32, %s3308_s26, %s1944_s23   ;;  %v1434_v61 = vld [vmem:[%s3297_s28] sm:$0x1] }
 0x4bc   : > { %s2332_s27 = spop %2331 }
 0x4bd   : > { %v1556_v9 = vstv %s2332_s27 }
 0x4be   : > { %v1557_v54 = vadd.f32 %v1556_v9, %v1434_v61 }
 0x4c0   : > { %1559 = vst.msk [vmem:[%s3297_s28] sm:$0x1] %vm397_vm14, %v1557_v54 }
 0x4c1 PF: > { %p2339_p3 = scmp.ge.s32.totalorder %s2641_s14, 2  ;;  %s1975_s20 = sand.u32 1, %s2621_s30  }
 0x4c2   : > { %s1976_s19 = scalar_lea.sflag [#allocation3], %s1975_s20 }
 0x4c3   : > { %p2336_p5 = pnand %p2339_p3, %p2749_p8 }
 0x4c5   : > { %2616 = dma.done.wait (!%p2336_p5), %s1976_s19, 32  }
 0x4c6   : > { %2618 = vsyncadd (!%p2336_p5), %s1976_s19, 4294967264  ;;  %s23_s14 = sadd.s32 1, %s2641_s14   ;;  %s3374_s30 = smov %s2625_s10 }
 0x4c7   : > { %p20_p4 = scmp.ge.s32.totalorder %s23_s14, 4   ;;  %s3375_s10 = smov %s2629_s11 }
 0x4c8   : > { %s3376_s11 = smov %s2755_s22  ;;  %s3377_s12 = smov %s2637_s13 }
 0x4c9   : > { %s3378_s13 = smov %s3380_s17  ;;  %22 = sbr.rel (!%p20_p4) target bundleno = 4 (0x4), region = 106 }
 0x4d0   :  { %1987 = vsyncpa [#allocation3], 1 }
 0x4d1   :  { %1989 = vsyncpa [#allocation3 + $0x1], 1 }

</bundles_post_ra>
